<compile_context>
chip_gen: v7x
topology: tpu7x:2x2x1
jax: 0.10.0
libtpu: 0.0.40
codegen_flags: <defaults>
</compile_context>

<pallas_src>
import functools

import jax
import jax.numpy as jnp
from jax.experimental import pallas as pl
from jax.experimental.pallas import tpu as pltpu


_LN_EPS = 1e-5


def _patch_embed_kernel(patches_ref, wp_ref, bp_ref, gamma_ref, beta_ref,
                        w1_ref, b1_ref, w2_ref, b2_ref, out_ref, x_ref,
                        *, e_true):
    """Grid = (row_tiles, depth_chunks); the depth-chunk axis is innermost.

    x_ref is a bf16 VMEM scratch carrying the running activation across the
    depth-chunk axis.  It is initialized under dc == 0 and read unconditionally
    afterwards -- correct because the depth axis is the innermost grid axis and
    scratch persists across grid steps (do not reorder the grid)."""
    dc = pl.program_id(1)
    last_dc = pl.num_programs(1) - 1
    cdt = x_ref.dtype

    # First depth chunk of each row tile: patchify-conv as a matmul + LayerNorm.
    @pl.when(dc == 0)
    def _project_and_norm():
        x = jnp.dot(patches_ref[...], wp_ref[...],
                    preferred_element_type=jnp.float32) + bp_ref[...]
        # Feature columns beyond e_true are exactly zero (zero-padded proj_w
        # columns / proj_b), so full-row sums equal true-column sums; LN stats
        # use the moments form with the true divisor.  gamma/beta are zero in
        # the padded columns, so the scratch stays exactly zero there.
        # Zero-padded tail *rows* only see proj_b + eps-regularized rsqrt:
        # finite, and sliced off in the wrapper.
        inv_e = 1.0 / float(e_true)
        mean = jnp.sum(x, axis=-1, keepdims=True) * inv_e
        var = jnp.sum(x * x, axis=-1, keepdims=True) * inv_e - mean * mean
        xn = (x - mean) * jax.lax.rsqrt(jnp.maximum(var, 0.0) + _LN_EPS)
        x_ref[...] = (xn * gamma_ref[...] + beta_ref[...]).astype(cdt)

    # This chunk's (Linear -> ReLU -> Linear) layers.  The per-layer activation
    # is carried in registers (static unroll over the chunk); only the matmul
    # accumulation is f32.
    x = x_ref[...]
    y = None
    for l in range(w1_ref.shape[0]):
        h = jnp.dot(x, w1_ref[l], preferred_element_type=jnp.float32) + b1_ref[l]
        h = jnp.maximum(h, 0.0).astype(cdt)
        y = jnp.dot(h, w2_ref[l], preferred_element_type=jnp.float32) + b2_ref[l]
        x = y.astype(cdt)

    # Carry to the next depth chunk; skip the redundant writeback on the last
    # chunk (only the f32 out_ref store is needed there).
    @pl.when(dc != last_dc)
    def _carry():
        x_ref[...] = x

    @pl.when(dc == last_dc)
    def _write_out():
        out_ref[...] = y.astype(out_ref.dtype)


def _extract_patches(x_nhwc, patch_size):
    """NHWC -> (B*Hp*Wp, P*P*C) token matrix, feature order (ph, pw, C).

    Channels stay in the minor (lane) axis -> no layout-hostile transpose."""
    B, H, W, C = x_nhwc.shape
    P = patch_size
    Hp, Wp = H // P, W // P
    x = x_nhwc.reshape(B, Hp, P, Wp, P, C)
    x = jnp.transpose(x, (0, 1, 3, 2, 4, 5))          # B, Hp, Wp, ph, pw, C
    return x.reshape(B * Hp * Wp, P * P * C), Hp, Wp


def _round_up(x, m):
    return (x + m - 1) // m * m


def _pad_to(a, shape):
    pads = [(0, t - s) for s, t in zip(a.shape, shape)]
    if all(p == (0, 0) for p in pads):
        return a
    return jnp.pad(a, pads)


def _live_vmem_bytes(tile_m, k_pad, e_pad, hh_pad, depth_chunk):
    """Rough double-buffered live-set estimate for the pallas_call."""
    bf, f32 = 2, 4
    b = 2 * tile_m * k_pad * bf                      # patches block
    b += 2 * k_pad * e_pad * bf                      # proj_w (const idx, 2 bufs)
    b += 2 * 3 * e_pad * f32                         # proj_b / gamma / beta
    b += 2 * depth_chunk * e_pad * hh_pad * bf       # W1 chunk
    b += 2 * depth_chunk * hh_pad * e_pad * bf       # W2 chunk
    b += 2 * depth_chunk * (hh_pad + e_pad) * f32    # b1 / b2 chunks
    b += 2 * tile_m * e_pad * f32                    # out block
    b += tile_m * e_pad * bf                         # activation scratch
    b += 2 * tile_m * max(hh_pad, e_pad) * f32       # headroom for h/y temporaries
    return b


def patch_embedding_forward(x_nhwc, params, patch_size, *, tile_m=512,
                            compute_dtype=jnp.bfloat16, vmem_budget_bytes=None):
    """PatchEmbedding forward. Returns (tokens (B, N, E), Hp, Wp)."""
    B = x_nhwc.shape[0]
    # TODO(synk): the patchify reshape/transpose materializes the (M, K) bf16
    # token matrix in HBM once; acceptable, could be fused via
    # allow_input_fusion if it ever dominates.
    patches, Hp, Wp = _extract_patches(x_nhwc.astype(compute_dtype), patch_size)
    M, K = patches.shape
    E = params["proj_w"].shape[1]
    depth, _, Hh = params["w1"].shape

    # Lane-dense feature dims (multiples of 128) -> unmasked stores, full MXU
    # tiles; zero padding keeps the math exact (see kernel comments).
    K_pad, E_pad, Hh_pad = (_round_up(d, 128) for d in (K, E, Hh))

    # Row tiling: multiple of 16 (bf16 sublane packing), clamped to the token
    # count, and split into >= 2 row tiles when possible so dual-TensorCore
    # parts can shard the "parallel" axis.
    tile_m = _round_up(min(tile_m, _round_up(M, 16)), 16)
    if M > 16 and _round_up(M, tile_m) // tile_m < 2:
        tile_m = _round_up((M + 1) // 2, 16)
    M_pad = _round_up(M, tile_m)
    num_row_tiles = M_pad // tile_m

    # Resident vs streamed MLP weights.
    if vmem_budget_bytes is None:
        try:
            vmem_budget_bytes = int(0.85 * pltpu.get_tpu_info().vmem_capacity_bytes)
        except Exception:
            vmem_budget_bytes = 48 * 1024 * 1024   # conservative (v7x-safe) fallback
    resident = _live_vmem_bytes(tile_m, K_pad, E_pad, Hh_pad, depth) <= vmem_budget_bytes
    depth_chunk = depth if resident else 1
    num_dc = 1 if resident else depth
    live = _live_vmem_bytes(tile_m, K_pad, E_pad, Hh_pad, depth_chunk)
    vmem_limit = int(min(vmem_budget_bytes, 2 * live + 8 * 1024 * 1024))

    patches = _pad_to(patches, (M_pad, K_pad))
    proj_w = _pad_to(params["proj_w"].astype(compute_dtype), (K_pad, E_pad))
    proj_b = _pad_to(params["proj_b"], (1, E_pad))
    gamma = _pad_to(params["gamma"], (1, E_pad))   # padded cols zero (not one)
    beta = _pad_to(params["beta"], (1, E_pad))
    w1 = _pad_to(params["w1"].astype(compute_dtype), (depth, E_pad, Hh_pad))
    b1 = _pad_to(params["b1"], (depth, 1, Hh_pad))
    w2 = _pad_to(params["w2"].astype(compute_dtype), (depth, Hh_pad, E_pad))
    b2 = _pad_to(params["b2"], (depth, 1, E_pad))

    nbytes = lambda a: a.size * jnp.dtype(a.dtype).itemsize
    weight_reads = 1 if resident else num_row_tiles
    cost = pl.CostEstimate(
        flops=2 * M_pad * K_pad * E_pad + 4 * depth * M_pad * E_pad * Hh_pad,
        transcendentals=M_pad,
        bytes_accessed=(nbytes(patches) + nbytes(proj_w) + nbytes(proj_b)
                        + nbytes(gamma) + nbytes(beta)
                        + weight_reads * (nbytes(w1) + nbytes(b1)
                                          + nbytes(w2) + nbytes(b2))
                        + M_pad * E_pad * 4))

    vec = lambda: pl.BlockSpec((1, E_pad), lambda i, dc: (0, 0))
    if resident:
        w_map = lambda i, dc: (0, 0, 0)
        dblk = depth
    else:
        w_map = lambda i, dc: (dc, 0, 0)
        dblk = 1

    out = pl.pallas_call(
        functools.partial(_patch_embed_kernel, e_true=E),
        out_shape=jax.ShapeDtypeStruct((M_pad, E_pad), jnp.float32),
        grid_spec=pltpu.PrefetchScalarGridSpec(
            num_scalar_prefetch=0,
            grid=(num_row_tiles, num_dc),
            in_specs=[
                pl.BlockSpec((tile_m, K_pad), lambda i, dc: (i, 0)),   # patches
                pl.BlockSpec((K_pad, E_pad), lambda i, dc: (0, 0)),    # proj W (resident)
                vec(), vec(), vec(),                                   # proj b, gamma, beta
                pl.BlockSpec((dblk, E_pad, Hh_pad), w_map),            # W1 stack / layer
                pl.BlockSpec((dblk, 1, Hh_pad), w_map),                # b1
                pl.BlockSpec((dblk, Hh_pad, E_pad), w_map),            # W2 stack / layer
                pl.BlockSpec((dblk, 1, E_pad), w_map),                 # b2
            ],
            out_specs=pl.BlockSpec((tile_m, E_pad), lambda i, dc: (i, 0)),
            scratch_shapes=[pltpu.VMEM((tile_m, E_pad), compute_dtype)],
        ),
        compiler_params=pltpu.CompilerParams(
            dimension_semantics=("parallel", "arbitrary"),
            vmem_limit_bytes=vmem_limit),
        cost_estimate=cost,
    )(patches, proj_w, proj_b, gamma, beta, w1, b1, w2, b2)

    return out[:M, :E].reshape(B, Hp * Wp, E), Hp, Wp


def init_params(key, in_channels, embed_dim, patch_size, depth):
    """Deterministic synthetic parameters (no checkpoint load)."""
    E = embed_dim
    Hh = int(embed_dim * 1.5)
    keys = jax.random.split(key, 6)
    conv_w = jax.random.normal(keys[0], (E, in_channels, patch_size, patch_size),
                               jnp.float32) * 0.05
    # (E, C, P, P) -> (ph, pw, C, E) -> (P*P*C, E): matches the (ph, pw, C)
    # feature order produced by _extract_patches (channels stay minor).
    proj_w = jnp.transpose(conv_w, (2, 3, 1, 0)).reshape(
        patch_size * patch_size * in_channels, E)
    proj_b = jax.random.normal(keys[1], (1, E), jnp.float32) * 0.05
    gamma = jnp.ones((1, E), jnp.float32)
    beta = jnp.zeros((1, E), jnp.float32)
    w1 = jax.random.normal(keys[2], (depth, E, Hh), jnp.float32) * 0.05
    b1 = jax.random.normal(keys[3], (depth, 1, Hh), jnp.float32) * 0.05
    w2 = jax.random.normal(keys[4], (depth, Hh, E), jnp.float32) * 0.05
    b2 = jax.random.normal(keys[5], (depth, 1, E), jnp.float32) * 0.05
    return {"proj_w": proj_w, "proj_b": proj_b, "gamma": gamma, "beta": beta,
            "w1": w1, "b1": b1, "w2": w2, "b2": b2}


def _reference_forward(x_nhwc, params, patch_size, compute_dtype=None):
    """Pure-JAX reference. compute_dtype=None -> full f32 (PyTorch semantics);
    compute_dtype=bf16 -> mirrors the kernel's mixed precision."""
    patches, Hp, Wp = _extract_patches(x_nhwc, patch_size)
    pw, w1s, w2s = params["proj_w"], params["w1"], params["w2"]
    if compute_dtype is not None:
        patches = patches.astype(compute_dtype)
        pw = pw.astype(compute_dtype)
        w1s = w1s.astype(compute_dtype)
        w2s = w2s.astype(compute_dtype)
    x = jnp.dot(patches, pw, preferred_element_type=jnp.float32) + params["proj_b"]
    mean = jnp.mean(x, axis=-1, keepdims=True)
    var = jnp.mean((x - mean) ** 2, axis=-1, keepdims=True)
    x = (x - mean) * jax.lax.rsqrt(var + _LN_EPS)
    x = x * params["gamma"] + params["beta"]
    for d in range(w1s.shape[0]):
        h = jnp.maximum(
            jnp.dot(x.astype(w1s.dtype), w1s[d],
                    preferred_element_type=jnp.float32) + params["b1"][d], 0.0)
        x = jnp.dot(h.astype(w2s.dtype), w2s[d],
                    preferred_element_type=jnp.float32) + params["b2"][d]
    B = x_nhwc.shape[0]
    return x.reshape(B, Hp * Wp, -1), Hp, Wp


if __name__ == "__main__":
    # Small shapes: B=2, H=W=16, C=4, patch_size=4 -> 32 tokens, embed_dim=32.
    B, H, W, C = 2, 16, 16, 4
    patch_size = 4
    embed_dim = 32
    depth = 7

    key = jax.random.PRNGKey(0)
    k_x, k_p = jax.random.split(key)
    x = jax.random.normal(k_x, (B, H, W, C), jnp.float32)
    params = init_params(k_p, C, embed_dim, patch_size, depth)

    fwd = jax.jit(functools.partial(patch_embedding_forward,
                                    patch_size=patch_size))
    out, Hp, Wp = fwd(x, params)
    out = jax.block_until_ready(out)
    Hp, Wp = int(Hp), int(Wp)

    N = (H // patch_size) * (W // patch_size)
    assert out.shape == (B, N, embed_dim)
    assert (Hp, Wp) == (H // patch_size, W // patch_size)

    # Tight check vs. a reference mirroring the kernel's bf16/f32 mixed precision.
    ref_mixed, _, _ = _reference_forward(x, params, patch_size,
                                         compute_dtype=jnp.bfloat16)
    assert jnp.allclose(out, ref_mixed, atol=2e-3, rtol=2e-3), \
        float(jnp.max(jnp.abs(out - ref_mixed)))

    # Looser check vs. the full-f32 PyTorch-equivalent reference.
    ref_f32, _, _ = _reference_forward(x, params, patch_size)
    assert jnp.allclose(out, ref_f32, atol=2e-2, rtol=2e-2), \
        float(jnp.max(jnp.abs(out - ref_f32)))

    print("KERNEL_OK")
</pallas_src>

<mosaic_0001>
module attributes {stable_mosaic.version = 11 : i64} {
  func.func @_patch_embed_kernel(%arg0: i32, %arg1: i32, %arg2: memref<16x128xbf16, #tpu.memory_space<vmem>>, %arg3: memref<128x128xbf16, #tpu.memory_space<vmem>>, %arg4: memref<1x128xf32, #tpu.memory_space<vmem>>, %arg5: memref<1x128xf32, #tpu.memory_space<vmem>>, %arg6: memref<1x128xf32, #tpu.memory_space<vmem>>, %arg7: memref<7x128x128xbf16, #tpu.memory_space<vmem>>, %arg8: memref<7x1x128xf32, #tpu.memory_space<vmem>>, %arg9: memref<7x128x128xbf16, #tpu.memory_space<vmem>>, %arg10: memref<7x1x128xf32, #tpu.memory_space<vmem>>, %arg11: memref<16x128xf32, #tpu.memory_space<vmem>>, %arg12: memref<16x128xbf16, #tpu.memory_space<vmem>>) attributes {dimension_semantics = [#tpu.dimension_semantics<parallel>, #tpu.dimension_semantics<arbitrary>], iteration_bounds = array<i64: 2, 1>, scalar_prefetch = 0 : i64, scratch_operands = 1 : i64, tpu.core_type = #tpu.core_type<tc>, window_params = [{transform_indices = @transform_0, window_bounds = array<i64: 16, 128>}, {pipeline_mode = #tpu.pipeline_mode<synchronous>, transform_indices = @transform_1, window_bounds = array<i64: 128, 128>}, {pipeline_mode = #tpu.pipeline_mode<synchronous>, transform_indices = @transform_2, window_bounds = array<i64: 1, 128>}, {pipeline_mode = #tpu.pipeline_mode<synchronous>, transform_indices = @transform_3, window_bounds = array<i64: 1, 128>}, {pipeline_mode = #tpu.pipeline_mode<synchronous>, transform_indices = @transform_4, window_bounds = array<i64: 1, 128>}, {pipeline_mode = #tpu.pipeline_mode<synchronous>, transform_indices = @transform_5, window_bounds = array<i64: 7, 128, 128>}, {pipeline_mode = #tpu.pipeline_mode<synchronous>, transform_indices = @transform_6, window_bounds = array<i64: 7, 1, 128>}, {pipeline_mode = #tpu.pipeline_mode<synchronous>, transform_indices = @transform_7, window_bounds = array<i64: 7, 128, 128>}, {pipeline_mode = #tpu.pipeline_mode<synchronous>, transform_indices = @transform_8, window_bounds = array<i64: 7, 1, 128>}, {transform_indices = @transform_9, window_bounds = array<i64: 16, 128>}]} {
    %c0_i32 = arith.constant 0 : i32
    %0 = arith.cmpi eq, %arg1, %c0_i32 : i32
    %1 = arith.extui %0 : i1 to i32
    %c0_i32_0 = arith.constant 0 : i32
    %2 = arith.cmpi ne, %1, %c0_i32_0 : i32
    scf.if %2 {
      %c0_104 = arith.constant 0 : index
      %c0_105 = arith.constant 0 : index
      %136 = vector.load %arg2[%c0_104, %c0_105] : memref<16x128xbf16, #tpu.memory_space<vmem>>, vector<16x128xbf16>
      %c0_106 = arith.constant 0 : index
      %c0_107 = arith.constant 0 : index
      %137 = vector.load %arg3[%c0_106, %c0_107] : memref<128x128xbf16, #tpu.memory_space<vmem>>, vector<128x128xbf16>
      %cst_108 = arith.constant dense<0.000000e+00> : vector<16x128xf32>
      %138 = tpu.matmul %136, %137, %cst_108 {dimension_numbers = #tpu.dot_dimension_numbers<[1], [0], [0], [1], [0, 0, 1, 1], [], []>} : vector<16x128xbf16>, vector<128x128xbf16>, vector<16x128xf32> -> vector<16x128xf32>
      %c0_109 = arith.constant 0 : index
      %c0_110 = arith.constant 0 : index
      %139 = vector.load %arg4[%c0_109, %c0_110] : memref<1x128xf32, #tpu.memory_space<vmem>>, vector<1x128xf32>
      %140 = vector.broadcast %139 : vector<1x128xf32> to vector<16x128xf32>
      %141 = arith.addf %138, %140 : vector<16x128xf32>
      %cst_111 = arith.constant dense<0.000000e+00> : vector<16xf32>
      %142 = vector.multi_reduction <add>, %141, %cst_111 [1] : vector<16x128xf32> to vector<16xf32>
      %143 = vector.shape_cast %142 : vector<16xf32> to vector<16x1xf32>
      %cst_112 = arith.constant 3.125000e-02 : f32
      %144 = vector.broadcast %cst_112 : f32 to vector<16x1xf32>
      %145 = arith.mulf %143, %144 : vector<16x1xf32>
      %146 = arith.mulf %141, %141 : vector<16x128xf32>
      %cst_113 = arith.constant dense<0.000000e+00> : vector<16xf32>
      %147 = vector.multi_reduction <add>, %146, %cst_113 [1] : vector<16x128xf32> to vector<16xf32>
      %148 = vector.shape_cast %147 : vector<16xf32> to vector<16x1xf32>
      %cst_114 = arith.constant 3.125000e-02 : f32
      %149 = vector.broadcast %cst_114 : f32 to vector<16x1xf32>
      %150 = arith.mulf %148, %149 : vector<16x1xf32>
      %151 = arith.mulf %145, %145 : vector<16x1xf32>
      %152 = arith.subf %150, %151 : vector<16x1xf32>
      %153 = vector.broadcast %145 : vector<16x1xf32> to vector<16x128xf32>
      %154 = arith.subf %141, %153 : vector<16x128xf32>
      %cst_115 = arith.constant 0.000000e+00 : f32
      %155 = vector.broadcast %cst_115 : f32 to vector<16x1xf32>
      %156 = arith.maximumf %152, %155 : vector<16x1xf32>
      %cst_116 = arith.constant 9.99999974E-6 : f32
      %157 = vector.broadcast %cst_116 : f32 to vector<16x1xf32>
      %158 = arith.addf %156, %157 : vector<16x1xf32>
      %159 = math.rsqrt %158 : vector<16x1xf32>
      %160 = vector.broadcast %159 : vector<16x1xf32> to vector<16x128xf32>
      %161 = arith.mulf %154, %160 : vector<16x128xf32>
      %c0_117 = arith.constant 0 : index
      %c0_118 = arith.constant 0 : index
      %162 = vector.load %arg5[%c0_117, %c0_118] : memref<1x128xf32, #tpu.memory_space<vmem>>, vector<1x128xf32>
      %163 = vector.broadcast %162 : vector<1x128xf32> to vector<16x128xf32>
      %164 = arith.mulf %161, %163 : vector<16x128xf32>
      %c0_119 = arith.constant 0 : index
      %c0_120 = arith.constant 0 : index
      %165 = vector.load %arg6[%c0_119, %c0_120] : memref<1x128xf32, #tpu.memory_space<vmem>>, vector<1x128xf32>
      %166 = vector.broadcast %165 : vector<1x128xf32> to vector<16x128xf32>
      %167 = arith.addf %164, %166 : vector<16x128xf32>
      %168 = arith.truncf %167 : vector<16x128xf32> to vector<16x128xbf16>
      %c0_121 = arith.constant 0 : index
      %c0_122 = arith.constant 0 : index
      %169 = vector.load %arg12[%c0_121, %c0_122] : memref<16x128xbf16, #tpu.memory_space<vmem>>, vector<16x128xbf16>
      tpu.vector_store %arg12[%c0_121, %c0_122], %168 {strides = array<i32>} : memref<16x128xbf16, #tpu.memory_space<vmem>>, vector<16x128xbf16>,
    } else {
    }
    %c0 = arith.constant 0 : index
    %c0_1 = arith.constant 0 : index
    %3 = vector.load %arg12[%c0, %c0_1] : memref<16x128xbf16, #tpu.memory_space<vmem>>, vector<16x128xbf16>
    %c0_2 = arith.constant 0 : index
    %c0_3 = arith.constant 0 : index
    %c0_4 = arith.constant 0 : index
    %4 = vector.load %arg7[%c0_2, %c0_3, %c0_4] : memref<7x128x128xbf16, #tpu.memory_space<vmem>>, vector<1x128x128xbf16>
    %5 = vector.shape_cast %4 : vector<1x128x128xbf16> to vector<128x128xbf16>
    %cst = arith.constant dense<0.000000e+00> : vector<16x128xf32>
    %6 = tpu.matmul %3, %5, %cst {dimension_numbers = #tpu.dot_dimension_numbers<[1], [0], [0], [1], [0, 0, 1, 1], [], []>} : vector<16x128xbf16>, vector<128x128xbf16>, vector<16x128xf32> -> vector<16x128xf32>
    %c0_5 = arith.constant 0 : index
    %c0_6 = arith.constant 0 : index
    %c0_7 = arith.constant 0 : index
    %7 = vector.load %arg8[%c0_5, %c0_6, %c0_7] : memref<7x1x128xf32, #tpu.memory_space<vmem>>, vector<1x1x128xf32>
    %8 = vector.shape_cast %7 : vector<1x1x128xf32> to vector<1x128xf32>
    %9 = vector.broadcast %8 : vector<1x128xf32> to vector<16x128xf32>
    %10 = arith.addf %6, %9 : vector<16x128xf32>
    %cst_8 = arith.constant 0.000000e+00 : f32
    %11 = vector.broadcast %cst_8 : f32 to vector<16x128xf32>
    %12 = arith.maximumf %10, %11 : vector<16x128xf32>
    %13 = arith.truncf %12 : vector<16x128xf32> to vector<16x128xbf16>
    %c0_9 = arith.constant 0 : index
    %c0_10 = arith.constant 0 : index
    %c0_11 = arith.constant 0 : index
    %14 = vector.load %arg9[%c0_9, %c0_10, %c0_11] : memref<7x128x128xbf16, #tpu.memory_space<vmem>>, vector<1x128x128xbf16>
    %15 = vector.shape_cast %14 : vector<1x128x128xbf16> to vector<128x128xbf16>
    %cst_12 = arith.constant dense<0.000000e+00> : vector<16x128xf32>
    %16 = tpu.matmul %13, %15, %cst_12 {dimension_numbers = #tpu.dot_dimension_numbers<[1], [0], [0], [1], [0, 0, 1, 1], [], []>} : vector<16x128xbf16>, vector<128x128xbf16>, vector<16x128xf32> -> vector<16x128xf32>
    %c0_13 = arith.constant 0 : index
    %c0_14 = arith.constant 0 : index
    %c0_15 = arith.constant 0 : index
    %17 = vector.load %arg10[%c0_13, %c0_14, %c0_15] : memref<7x1x128xf32, #tpu.memory_space<vmem>>, vector<1x1x128xf32>
    %18 = vector.shape_cast %17 : vector<1x1x128xf32> to vector<1x128xf32>
    %19 = vector.broadcast %18 : vector<1x128xf32> to vector<16x128xf32>
    %20 = arith.addf %16, %19 : vector<16x128xf32>
    %21 = arith.truncf %20 : vector<16x128xf32> to vector<16x128xbf16>
    %c1 = arith.constant 1 : index
    %c0_16 = arith.constant 0 : index
    %c0_17 = arith.constant 0 : index
    %22 = vector.load %arg7[%c1, %c0_16, %c0_17] : memref<7x128x128xbf16, #tpu.memory_space<vmem>>, vector<1x128x128xbf16>
    %23 = vector.shape_cast %22 : vector<1x128x128xbf16> to vector<128x128xbf16>
    %cst_18 = arith.constant dense<0.000000e+00> : vector<16x128xf32>
    %24 = tpu.matmul %21, %23, %cst_18 {dimension_numbers = #tpu.dot_dimension_numbers<[1], [0], [0], [1], [0, 0, 1, 1], [], []>} : vector<16x128xbf16>, vector<128x128xbf16>, vector<16x128xf32> -> vector<16x128xf32>
    %c1_19 = arith.constant 1 : index
    %c0_20 = arith.constant 0 : index
    %c0_21 = arith.constant 0 : index
    %25 = vector.load %arg8[%c1_19, %c0_20, %c0_21] : memref<7x1x128xf32, #tpu.memory_space<vmem>>, vector<1x1x128xf32>
    %26 = vector.shape_cast %25 : vector<1x1x128xf32> to vector<1x128xf32>
    %27 = vector.broadcast %26 : vector<1x128xf32> to vector<16x128xf32>
    %28 = arith.addf %24, %27 : vector<16x128xf32>
    %cst_22 = arith.constant 0.000000e+00 : f32
    %29 = vector.broadcast %cst_22 : f32 to vector<16x128xf32>
    %30 = arith.maximumf %28, %29 : vector<16x128xf32>
    %31 = arith.truncf %30 : vector<16x128xf32> to vector<16x128xbf16>
    %c1_23 = arith.constant 1 : index
    %c0_24 = arith.constant 0 : index
    %c0_25 = arith.constant 0 : index
    %32 = vector.load %arg9[%c1_23, %c0_24, %c0_25] : memref<7x128x128xbf16, #tpu.memory_space<vmem>>, vector<1x128x128xbf16>
    %33 = vector.shape_cast %32 : vector<1x128x128xbf16> to vector<128x128xbf16>
    %cst_26 = arith.constant dense<0.000000e+00> : vector<16x128xf32>
    %34 = tpu.matmul %31, %33, %cst_26 {dimension_numbers = #tpu.dot_dimension_numbers<[1], [0], [0], [1], [0, 0, 1, 1], [], []>} : vector<16x128xbf16>, vector<128x128xbf16>, vector<16x128xf32> -> vector<16x128xf32>
    %c1_27 = arith.constant 1 : index
    %c0_28 = arith.constant 0 : index
    %c0_29 = arith.constant 0 : index
    %35 = vector.load %arg10[%c1_27, %c0_28, %c0_29] : memref<7x1x128xf32, #tpu.memory_space<vmem>>, vector<1x1x128xf32>
    %36 = vector.shape_cast %35 : vector<1x1x128xf32> to vector<1x128xf32>
    %37 = vector.broadcast %36 : vector<1x128xf32> to vector<16x128xf32>
    %38 = arith.addf %34, %37 : vector<16x128xf32>
    %39 = arith.truncf %38 : vector<16x128xf32> to vector<16x128xbf16>
    %c2 = arith.constant 2 : index
    %c0_30 = arith.constant 0 : index
    %c0_31 = arith.constant 0 : index
    %40 = vector.load %arg7[%c2, %c0_30, %c0_31] : memref<7x128x128xbf16, #tpu.memory_space<vmem>>, vector<1x128x128xbf16>
    %41 = vector.shape_cast %40 : vector<1x128x128xbf16> to vector<128x128xbf16>
    %cst_32 = arith.constant dense<0.000000e+00> : vector<16x128xf32>
    %42 = tpu.matmul %39, %41, %cst_32 {dimension_numbers = #tpu.dot_dimension_numbers<[1], [0], [0], [1], [0, 0, 1, 1], [], []>} : vector<16x128xbf16>, vector<128x128xbf16>, vector<16x128xf32> -> vector<16x128xf32>
    %c2_33 = arith.constant 2 : index
    %c0_34 = arith.constant 0 : index
    %c0_35 = arith.constant 0 : index
    %43 = vector.load %arg8[%c2_33, %c0_34, %c0_35] : memref<7x1x128xf32, #tpu.memory_space<vmem>>, vector<1x1x128xf32>
    %44 = vector.shape_cast %43 : vector<1x1x128xf32> to vector<1x128xf32>
    %45 = vector.broadcast %44 : vector<1x128xf32> to vector<16x128xf32>
    %46 = arith.addf %42, %45 : vector<16x128xf32>
    %cst_36 = arith.constant 0.000000e+00 : f32
    %47 = vector.broadcast %cst_36 : f32 to vector<16x128xf32>
    %48 = arith.maximumf %46, %47 : vector<16x128xf32>
    %49 = arith.truncf %48 : vector<16x128xf32> to vector<16x128xbf16>
    %c2_37 = arith.constant 2 : index
    %c0_38 = arith.constant 0 : index
    %c0_39 = arith.constant 0 : index
    %50 = vector.load %arg9[%c2_37, %c0_38, %c0_39] : memref<7x128x128xbf16, #tpu.memory_space<vmem>>, vector<1x128x128xbf16>
    %51 = vector.shape_cast %50 : vector<1x128x128xbf16> to vector<128x128xbf16>
    %cst_40 = arith.constant dense<0.000000e+00> : vector<16x128xf32>
    %52 = tpu.matmul %49, %51, %cst_40 {dimension_numbers = #tpu.dot_dimension_numbers<[1], [0], [0], [1], [0, 0, 1, 1], [], []>} : vector<16x128xbf16>, vector<128x128xbf16>, vector<16x128xf32> -> vector<16x128xf32>
    %c2_41 = arith.constant 2 : index
    %c0_42 = arith.constant 0 : index
    %c0_43 = arith.constant 0 : index
    %53 = vector.load %arg10[%c2_41, %c0_42, %c0_43] : memref<7x1x128xf32, #tpu.memory_space<vmem>>, vector<1x1x128xf32>
    %54 = vector.shape_cast %53 : vector<1x1x128xf32> to vector<1x128xf32>
    %55 = vector.broadcast %54 : vector<1x128xf32> to vector<16x128xf32>
    %56 = arith.addf %52, %55 : vector<16x128xf32>
    %57 = arith.truncf %56 : vector<16x128xf32> to vector<16x128xbf16>
    %c3 = arith.constant 3 : index
    %c0_44 = arith.constant 0 : index
    %c0_45 = arith.constant 0 : index
    %58 = vector.load %arg7[%c3, %c0_44, %c0_45] : memref<7x128x128xbf16, #tpu.memory_space<vmem>>, vector<1x128x128xbf16>
    %59 = vector.shape_cast %58 : vector<1x128x128xbf16> to vector<128x128xbf16>
    %cst_46 = arith.constant dense<0.000000e+00> : vector<16x128xf32>
    %60 = tpu.matmul %57, %59, %cst_46 {dimension_numbers = #tpu.dot_dimension_numbers<[1], [0], [0], [1], [0, 0, 1, 1], [], []>} : vector<16x128xbf16>, vector<128x128xbf16>, vector<16x128xf32> -> vector<16x128xf32>
    %c3_47 = arith.constant 3 : index
    %c0_48 = arith.constant 0 : index
    %c0_49 = arith.constant 0 : index
    %61 = vector.load %arg8[%c3_47, %c0_48, %c0_49] : memref<7x1x128xf32, #tpu.memory_space<vmem>>, vector<1x1x128xf32>
    %62 = vector.shape_cast %61 : vector<1x1x128xf32> to vector<1x128xf32>
    %63 = vector.broadcast %62 : vector<1x128xf32> to vector<16x128xf32>
    %64 = arith.addf %60, %63 : vector<16x128xf32>
    %cst_50 = arith.constant 0.000000e+00 : f32
    %65 = vector.broadcast %cst_50 : f32 to vector<16x128xf32>
    %66 = arith.maximumf %64, %65 : vector<16x128xf32>
    %67 = arith.truncf %66 : vector<16x128xf32> to vector<16x128xbf16>
    %c3_51 = arith.constant 3 : index
    %c0_52 = arith.constant 0 : index
    %c0_53 = arith.constant 0 : index
    %68 = vector.load %arg9[%c3_51, %c0_52, %c0_53] : memref<7x128x128xbf16, #tpu.memory_space<vmem>>, vector<1x128x128xbf16>
    %69 = vector.shape_cast %68 : vector<1x128x128xbf16> to vector<128x128xbf16>
    %cst_54 = arith.constant dense<0.000000e+00> : vector<16x128xf32>
    %70 = tpu.matmul %67, %69, %cst_54 {dimension_numbers = #tpu.dot_dimension_numbers<[1], [0], [0], [1], [0, 0, 1, 1], [], []>} : vector<16x128xbf16>, vector<128x128xbf16>, vector<16x128xf32> -> vector<16x128xf32>
    %c3_55 = arith.constant 3 : index
    %c0_56 = arith.constant 0 : index
    %c0_57 = arith.constant 0 : index
    %71 = vector.load %arg10[%c3_55, %c0_56, %c0_57] : memref<7x1x128xf32, #tpu.memory_space<vmem>>, vector<1x1x128xf32>
    %72 = vector.shape_cast %71 : vector<1x1x128xf32> to vector<1x128xf32>
    %73 = vector.broadcast %72 : vector<1x128xf32> to vector<16x128xf32>
    %74 = arith.addf %70, %73 : vector<16x128xf32>
    %75 = arith.truncf %74 : vector<16x128xf32> to vector<16x128xbf16>
    %c4 = arith.constant 4 : index
    %c0_58 = arith.constant 0 : index
    %c0_59 = arith.constant 0 : index
    %76 = vector.load %arg7[%c4, %c0_58, %c0_59] : memref<7x128x128xbf16, #tpu.memory_space<vmem>>, vector<1x128x128xbf16>
    %77 = vector.shape_cast %76 : vector<1x128x128xbf16> to vector<128x128xbf16>
    %cst_60 = arith.constant dense<0.000000e+00> : vector<16x128xf32>
    %78 = tpu.matmul %75, %77, %cst_60 {dimension_numbers = #tpu.dot_dimension_numbers<[1], [0], [0], [1], [0, 0, 1, 1], [], []>} : vector<16x128xbf16>, vector<128x128xbf16>, vector<16x128xf32> -> vector<16x128xf32>
    %c4_61 = arith.constant 4 : index
    %c0_62 = arith.constant 0 : index
    %c0_63 = arith.constant 0 : index
    %79 = vector.load %arg8[%c4_61, %c0_62, %c0_63] : memref<7x1x128xf32, #tpu.memory_space<vmem>>, vector<1x1x128xf32>
    %80 = vector.shape_cast %79 : vector<1x1x128xf32> to vector<1x128xf32>
    %81 = vector.broadcast %80 : vector<1x128xf32> to vector<16x128xf32>
    %82 = arith.addf %78, %81 : vector<16x128xf32>
    %cst_64 = arith.constant 0.000000e+00 : f32
    %83 = vector.broadcast %cst_64 : f32 to vector<16x128xf32>
    %84 = arith.maximumf %82, %83 : vector<16x128xf32>
    %85 = arith.truncf %84 : vector<16x128xf32> to vector<16x128xbf16>
    %c4_65 = arith.constant 4 : index
    %c0_66 = arith.constant 0 : index
    %c0_67 = arith.constant 0 : index
    %86 = vector.load %arg9[%c4_65, %c0_66, %c0_67] : memref<7x128x128xbf16, #tpu.memory_space<vmem>>, vector<1x128x128xbf16>
    %87 = vector.shape_cast %86 : vector<1x128x128xbf16> to vector<128x128xbf16>
    %cst_68 = arith.constant dense<0.000000e+00> : vector<16x128xf32>
    %88 = tpu.matmul %85, %87, %cst_68 {dimension_numbers = #tpu.dot_dimension_numbers<[1], [0], [0], [1], [0, 0, 1, 1], [], []>} : vector<16x128xbf16>, vector<128x128xbf16>, vector<16x128xf32> -> vector<16x128xf32>
    %c4_69 = arith.constant 4 : index
    %c0_70 = arith.constant 0 : index
    %c0_71 = arith.constant 0 : index
    %89 = vector.load %arg10[%c4_69, %c0_70, %c0_71] : memref<7x1x128xf32, #tpu.memory_space<vmem>>, vector<1x1x128xf32>
    %90 = vector.shape_cast %89 : vector<1x1x128xf32> to vector<1x128xf32>
    %91 = vector.broadcast %90 : vector<1x128xf32> to vector<16x128xf32>
    %92 = arith.addf %88, %91 : vector<16x128xf32>
    %93 = arith.truncf %92 : vector<16x128xf32> to vector<16x128xbf16>
    %c5 = arith.constant 5 : index
    %c0_72 = arith.constant 0 : index
    %c0_73 = arith.constant 0 : index
    %94 = vector.load %arg7[%c5, %c0_72, %c0_73] : memref<7x128x128xbf16, #tpu.memory_space<vmem>>, vector<1x128x128xbf16>
    %95 = vector.shape_cast %94 : vector<1x128x128xbf16> to vector<128x128xbf16>
    %cst_74 = arith.constant dense<0.000000e+00> : vector<16x128xf32>
    %96 = tpu.matmul %93, %95, %cst_74 {dimension_numbers = #tpu.dot_dimension_numbers<[1], [0], [0], [1], [0, 0, 1, 1], [], []>} : vector<16x128xbf16>, vector<128x128xbf16>, vector<16x128xf32> -> vector<16x128xf32>
    %c5_75 = arith.constant 5 : index
    %c0_76 = arith.constant 0 : index
    %c0_77 = arith.constant 0 : index
    %97 = vector.load %arg8[%c5_75, %c0_76, %c0_77] : memref<7x1x128xf32, #tpu.memory_space<vmem>>, vector<1x1x128xf32>
    %98 = vector.shape_cast %97 : vector<1x1x128xf32> to vector<1x128xf32>
    %99 = vector.broadcast %98 : vector<1x128xf32> to vector<16x128xf32>
    %100 = arith.addf %96, %99 : vector<16x128xf32>
    %cst_78 = arith.constant 0.000000e+00 : f32
    %101 = vector.broadcast %cst_78 : f32 to vector<16x128xf32>
    %102 = arith.maximumf %100, %101 : vector<16x128xf32>
    %103 = arith.truncf %102 : vector<16x128xf32> to vector<16x128xbf16>
    %c5_79 = arith.constant 5 : index
    %c0_80 = arith.constant 0 : index
    %c0_81 = arith.constant 0 : index
    %104 = vector.load %arg9[%c5_79, %c0_80, %c0_81] : memref<7x128x128xbf16, #tpu.memory_space<vmem>>, vector<1x128x128xbf16>
    %105 = vector.shape_cast %104 : vector<1x128x128xbf16> to vector<128x128xbf16>
    %cst_82 = arith.constant dense<0.000000e+00> : vector<16x128xf32>
    %106 = tpu.matmul %103, %105, %cst_82 {dimension_numbers = #tpu.dot_dimension_numbers<[1], [0], [0], [1], [0, 0, 1, 1], [], []>} : vector<16x128xbf16>, vector<128x128xbf16>, vector<16x128xf32> -> vector<16x128xf32>
    %c5_83 = arith.constant 5 : index
    %c0_84 = arith.constant 0 : index
    %c0_85 = arith.constant 0 : index
    %107 = vector.load %arg10[%c5_83, %c0_84, %c0_85] : memref<7x1x128xf32, #tpu.memory_space<vmem>>, vector<1x1x128xf32>
    %108 = vector.shape_cast %107 : vector<1x1x128xf32> to vector<1x128xf32>
    %109 = vector.broadcast %108 : vector<1x128xf32> to vector<16x128xf32>
    %110 = arith.addf %106, %109 : vector<16x128xf32>
    %111 = arith.truncf %110 : vector<16x128xf32> to vector<16x128xbf16>
    %c6 = arith.constant 6 : index
    %c0_86 = arith.constant 0 : index
    %c0_87 = arith.constant 0 : index
    %112 = vector.load %arg7[%c6, %c0_86, %c0_87] : memref<7x128x128xbf16, #tpu.memory_space<vmem>>, vector<1x128x128xbf16>
    %113 = vector.shape_cast %112 : vector<1x128x128xbf16> to vector<128x128xbf16>
    %cst_88 = arith.constant dense<0.000000e+00> : vector<16x128xf32>
    %114 = tpu.matmul %111, %113, %cst_88 {dimension_numbers = #tpu.dot_dimension_numbers<[1], [0], [0], [1], [0, 0, 1, 1], [], []>} : vector<16x128xbf16>, vector<128x128xbf16>, vector<16x128xf32> -> vector<16x128xf32>
    %c6_89 = arith.constant 6 : index
    %c0_90 = arith.constant 0 : index
    %c0_91 = arith.constant 0 : index
    %115 = vector.load %arg8[%c6_89, %c0_90, %c0_91] : memref<7x1x128xf32, #tpu.memory_space<vmem>>, vector<1x1x128xf32>
    %116 = vector.shape_cast %115 : vector<1x1x128xf32> to vector<1x128xf32>
    %117 = vector.broadcast %116 : vector<1x128xf32> to vector<16x128xf32>
    %118 = arith.addf %114, %117 : vector<16x128xf32>
    %cst_92 = arith.constant 0.000000e+00 : f32
    %119 = vector.broadcast %cst_92 : f32 to vector<16x128xf32>
    %120 = arith.maximumf %118, %119 : vector<16x128xf32>
    %121 = arith.truncf %120 : vector<16x128xf32> to vector<16x128xbf16>
    %c6_93 = arith.constant 6 : index
    %c0_94 = arith.constant 0 : index
    %c0_95 = arith.constant 0 : index
    %122 = vector.load %arg9[%c6_93, %c0_94, %c0_95] : memref<7x128x128xbf16, #tpu.memory_space<vmem>>, vector<1x128x128xbf16>
    %123 = vector.shape_cast %122 : vector<1x128x128xbf16> to vector<128x128xbf16>
    %cst_96 = arith.constant dense<0.000000e+00> : vector<16x128xf32>
    %124 = tpu.matmul %121, %123, %cst_96 {dimension_numbers = #tpu.dot_dimension_numbers<[1], [0], [0], [1], [0, 0, 1, 1], [], []>} : vector<16x128xbf16>, vector<128x128xbf16>, vector<16x128xf32> -> vector<16x128xf32>
    %c6_97 = arith.constant 6 : index
    %c0_98 = arith.constant 0 : index
    %c0_99 = arith.constant 0 : index
    %125 = vector.load %arg10[%c6_97, %c0_98, %c0_99] : memref<7x1x128xf32, #tpu.memory_space<vmem>>, vector<1x1x128xf32>
    %126 = vector.shape_cast %125 : vector<1x1x128xf32> to vector<1x128xf32>
    %127 = vector.broadcast %126 : vector<1x128xf32> to vector<16x128xf32>
    %128 = arith.addf %124, %127 : vector<16x128xf32>
    %129 = arith.truncf %128 : vector<16x128xf32> to vector<16x128xbf16>
    %c0_i32_100 = arith.constant 0 : i32
    %130 = arith.cmpi ne, %arg1, %c0_i32_100 : i32
    %131 = arith.extui %130 : i1 to i32
    %c0_i32_101 = arith.constant 0 : i32
    %132 = arith.cmpi ne, %131, %c0_i32_101 : i32
    scf.if %132 {
      %c0_104 = arith.constant 0 : index
      %c0_105 = arith.constant 0 : index
      %136 = vector.load %arg12[%c0_104, %c0_105] : memref<16x128xbf16, #tpu.memory_space<vmem>>, vector<16x128xbf16>
      tpu.vector_store %arg12[%c0_104, %c0_105], %129 {strides = array<i32>} : memref<16x128xbf16, #tpu.memory_space<vmem>>, vector<16x128xbf16>,
    } else {
    }
    %c0_i32_102 = arith.constant 0 : i32
    %133 = arith.cmpi eq, %arg1, %c0_i32_102 : i32
    %134 = arith.extui %133 : i1 to i32
    %c0_i32_103 = arith.constant 0 : i32
    %135 = arith.cmpi ne, %134, %c0_i32_103 : i32
    scf.if %135 {
      %c0_104 = arith.constant 0 : index
      %c0_105 = arith.constant 0 : index
      %136 = vector.load %arg11[%c0_104, %c0_105] : memref<16x128xf32, #tpu.memory_space<vmem>>, vector<16x128xf32>
      tpu.vector_store %arg11[%c0_104, %c0_105], %128 {strides = array<i32>} : memref<16x128xf32, #tpu.memory_space<vmem>>, vector<16x128xf32>,
    } else {
    }
    return
  }
  func.func @transform_0(%arg0: i32, %arg1: i32) -> (i32, i32) {
    %c0_i32 = arith.constant 0 : i32
    %c0_i32_0 = arith.constant 0 : i32
    return %arg0, %c0_i32 : i32, i32
  }
  func.func @transform_1(%arg0: i32, %arg1: i32) -> (i32, i32) {
    %c0_i32 = arith.constant 0 : i32
    %c0_i32_0 = arith.constant 0 : i32
    %c0_i32_1 = arith.constant 0 : i32
    return %c0_i32, %c0_i32_0 : i32, i32
  }
  func.func @transform_2(%arg0: i32, %arg1: i32) -> (i32, i32) {
    %c0_i32 = arith.constant 0 : i32
    %c0_i32_0 = arith.constant 0 : i32
    %c0_i32_1 = arith.constant 0 : i32
    return %c0_i32, %c0_i32_0 : i32, i32
  }
  func.func @transform_3(%arg0: i32, %arg1: i32) -> (i32, i32) {
    %c0_i32 = arith.constant 0 : i32
    %c0_i32_0 = arith.constant 0 : i32
    %c0_i32_1 = arith.constant 0 : i32
    return %c0_i32, %c0_i32_0 : i32, i32
  }
  func.func @transform_4(%arg0: i32, %arg1: i32) -> (i32, i32) {
    %c0_i32 = arith.constant 0 : i32
    %c0_i32_0 = arith.constant 0 : i32
    %c0_i32_1 = arith.constant 0 : i32
    return %c0_i32, %c0_i32_0 : i32, i32
  }
  func.func @transform_5(%arg0: i32, %arg1: i32) -> (i32, i32, i32) {
    %c0_i32 = arith.constant 0 : i32
    %c0_i32_0 = arith.constant 0 : i32
    %c0_i32_1 = arith.constant 0 : i32
    %c0_i32_2 = arith.constant 0 : i32
    return %c0_i32, %c0_i32_0, %c0_i32_1 : i32, i32, i32
  }
  func.func @transform_6(%arg0: i32, %arg1: i32) -> (i32, i32, i32) {
    %c0_i32 = arith.constant 0 : i32
    %c0_i32_0 = arith.constant 0 : i32
    %c0_i32_1 = arith.constant 0 : i32
    %c0_i32_2 = arith.constant 0 : i32
    return %c0_i32, %c0_i32_0, %c0_i32_1 : i32, i32, i32
  }
  func.func @transform_7(%arg0: i32, %arg1: i32) -> (i32, i32, i32) {
    %c0_i32 = arith.constant 0 : i32
    %c0_i32_0 = arith.constant 0 : i32
    %c0_i32_1 = arith.constant 0 : i32
    %c0_i32_2 = arith.constant 0 : i32
    return %c0_i32, %c0_i32_0, %c0_i32_1 : i32, i32, i32
  }
  func.func @transform_8(%arg0: i32, %arg1: i32) -> (i32, i32, i32) {
    %c0_i32 = arith.constant 0 : i32
    %c0_i32_0 = arith.constant 0 : i32
    %c0_i32_1 = arith.constant 0 : i32
    %c0_i32_2 = arith.constant 0 : i32
    return %c0_i32, %c0_i32_0, %c0_i32_1 : i32, i32, i32
  }
  func.func @transform_9(%arg0: i32, %arg1: i32) -> (i32, i32) {
    %c0_i32 = arith.constant 0 : i32
    %c0_i32_0 = arith.constant 0 : i32
    return %arg0, %c0_i32 : i32, i32
  }
}

</mosaic_0001>

<bundles_post_ra>
// kernel: patch_embedding_forward.1
= control target key start
LH: loop header
LB: loop body
LE: loop exit
PB: predicated region body
PF: predicated region fallthrough
CT: control target
= control target key end

     0   :  { %14 = vsyncpa [#allocation4], 0  ;;  %s4031_s0 = inlined_call_operand.vmem [shape: bf16[32,128], index: 0, kind: input, shape index: {}]   ;;  %s4032_s1 = inlined_call_operand.vmem [shape: bf16[128,128], index: 1, kind: input, shape index: {}]   ;;  %s4033_s2 = inlined_call_operand.vmem [shape: f32[1,128], index: 2, kind: input, shape index: {}]   ;;  %s4034_s3 = inlined_call_operand.vmem [shape: f32[1,128], index: 3, kind: input, shape index: {}]   ;;  %s4035_s4 = inlined_call_operand.vmem [shape: f32[1,128], index: 4, kind: input, shape index: {}]   ;;  %s4036_s5 = inlined_call_operand.vmem [shape: bf16[7,128,128], index: 5, kind: input, shape index: {}]   ;;  %s4037_s6 = inlined_call_operand.vmem [shape: f32[7,1,128], index: 6, kind: input, shape index: {}]   ;;  %s4038_s7 = inlined_call_operand.vmem [shape: bf16[7,128,128], index: 7, kind: input, shape index: {}]   ;;  %s4039_s8 = inlined_call_operand.vmem [shape: f32[7,1,128], index: 8, kind: input, shape index: {}]   ;;  %s4040_s9 = inlined_call_operand.hbm [shape: f32[32,128], index: 9, kind: output, shape index: {}]  }
   0x1   :  { %16 = vsyncpa [#allocation4 + $0x1], 0  ;;  %s3344_s30 = smov 0   ;;  %s3346_s10 = smov 0  }
   0x2   :  { %s3348_s11 = smov 0   ;;  %s3350_s12 = smov 0  }
   0x3   :  { %s3352_s13 = smov 0   ;;  %s3354_s14 = smov 0  }
   0x4 LB: > { %s2234_s15 = sadd.s32 4294967295, %s3287_s14   ;;  %s2235_s16 = sadd.s32 4294967294, %s3287_s14   ;;  %s3287_s14 = sphi %s3354_s14, %s22_s14   ;;  %s3283_s13 = sphi %s3352_s13, %s4047_s13   ;;  %s3279_s12 = sphi %s3350_s12, %s4046_s12   ;;  %s3275_s11 = sphi %s3348_s11, %s4045_s11   ;;  %s3271_s10 = sphi %s3346_s10, %s4044_s10   ;;  %s3267_s30 = sphi %s3344_s30, %s4043_s30  }
   0x5   : > { %s34_s17 = sadd.s32 1, %s3283_s13  ;;  %s235_s18 = sadd.s32 1, %s3275_s11 }
   0x6   : > { %p36_p0 = scmp.ge.s32.totalorder %s34_s17, 2  ;;  %p245_p1 = scmp.ne.s32.totalorder %s3275_s11, %s3271_s10 }
   0x7   : > { %p246_p2 = scmp.eq.s32.totalorder %s2234_s15, 1  ;;  %p251_p3 = scmp.ne.s32.totalorder %s3271_s10, %s3267_s30 }
   0x8   : > { %s4049_s17 = smov (%p36_p0, %s34_s17), 0  ;;  %p252_p5 = scmp.eq.s32.totalorder %s2235_s16, 1 }
   0x9   : > { %p3384_p4 = por %p246_p2, %p245_p1  ;;  %s232_s20 = ssub.s32 %s3283_s13, %s4049_s17 }
   0xa   : > { %p2238_p6 = scmp.ge.s32.totalorder %s3287_s14, 1  ;;  %p233_p7 = scmp.eq.s32.totalorder %s232_s20, 0 }
   0xb   : > { %p3391_p8 = por %p252_p5, %p251_p3  ;;  %p303_p9 = scmp.lt.s32.totalorder %s3287_s14, 3 }
   0xc   : > { %s3397_s22 = scalar_select %p233_p7, %s3275_s11, %s235_s18  }
   0xd   : > { %p304_p10 = pnand %p2238_p6, %p303_p9 }
   0xe   : > { %v3084_v0 = vld [vmem:[%s4032_s1] sm:$0xff] (!%p304_p10)   ;;  %v3289_v1 = vmov (!%p304_p10), 0.0   ;;  %v3085_v2 = vld [vmem:[%s4032_s1 + $0x8] sm:$0xff] (!%p304_p10)   ;;  %vm3290_vm0 = vmmov (!%p304_p10), 0   ;;  %s2240_s27 = sshll.u32 (!%p304_p10), %s3279_s12, 1  ;;  %v3086_v3 = vld [vmem:[%s4032_s1 + $0x10] sm:$0xff] (!%p304_p10)  }
   0xf   : > { %307 = sbr.rel (%p304_p10) target bundleno = 3515 (0xdbb), region = 56  ;;  %2725 = vmatprep.subr.bf16.mxu0 (!%p304_p10), %v3289_v1  ;;  %2745 = vmatprep.subr.bf16.mxu1 (!%p304_p10), %v3289_v1  ;;  %p340_p11 = scmp.lt.s32.totalorder (!%p304_p10), %s2240_s27, 3  ;;  %v3087_v4 = vld [vmem:[%s4032_s1 + $0x18] sm:$0xff] (!%p304_p10)   ;;  %v3088_v5 = vld [vmem:[%s4032_s1 + $0x20] sm:$0xff] (!%p304_p10)   ;;  %v3089_v6 = vld [vmem:[%s4032_s1 + $0x28] sm:$0xff] (!%p304_p10)  }
  0x10   : > { %2726 = vmatpush3.bf16.msra.mxu0 (!%p304_p10), %v3084_v0  ;;  %2741 = vmatprep.mubr.msk.bf16.mxu0 (!%p304_p10), %vm3290_vm0, %v3289_v1  ;;  %v3090_v7 = vld [vmem:[%s4032_s1 + $0x30] sm:$0xff] (!%p304_p10)   ;;  %v3091_v8 = vld [vmem:[%s4032_s1 + $0x38] sm:$0xff] (!%p304_p10)   ;;  %v2242_v10 = vld [vmem:[%s4033_s2] ss:$0 sm:$0xff] (!%p304_p10)  ;;  %s336_s25 = sand.u32 (!%p304_p10), 1, %s3271_s10   ;;  %s2589_s16 = sshll.u32 (!%p304_p10), %s3279_s12, 8 }
  0x11   : > { %2727 = vmatprep.subr.bf16.mxu0 (!%p304_p10), %v3289_v1  ;;  %2761 = vmatprep.mubr.msk.bf16.mxu1 (!%p304_p10), %vm3290_vm0, %v3289_v1  ;;  %v3093_v19 = vld [vmem:[%s4036_s5] sm:$0xff] (!%p304_p10)   ;;  %v3094_v20 = vld [vmem:[%s4036_s5 + $0x8] sm:$0xff] (!%p304_p10)   ;;  %v3095_v21 = vld [vmem:[%s4036_s5 + $0x10] sm:$0xff] (!%p304_p10)   ;;  %s2239_s26 = sshll.u32 (!%p304_p10), %s336_s25, 4  ;;  %s3983_s24 = scalar_lea.hbm (!%p304_p10), %s4040_s9, %s2589_s16 }
  0x12   : > { %2746 = vmatpush3.bf16.msra.mxu1 (!%p304_p10), %v3093_v19  ;;  %v3096_v22 = vld [vmem:[%s4036_s5 + $0x18] sm:$0xff] (!%p304_p10)   ;;  %v3097_v23 = vld [vmem:[%s4036_s5 + $0x20] sm:$0xff] (!%p304_p10)   ;;  %v3098_v24 = vld [vmem:[%s4036_s5 + $0x28] sm:$0xff] (!%p304_p10)   ;;  %s338_s29 = scalar_lea.vmem (!%p304_p10), [#allocation3], %s2239_s26  ;;  %s3291_s26 = smov (!%p304_p10), [#allocation3]  }
  0x13   : > { %2747 = vmatprep.subr.bf16.mxu1 (!%p304_p10), %v3289_v1  ;;  %v3099_v25 = vld [vmem:[%s4036_s5 + $0x30] sm:$0xff] (!%p304_p10)   ;;  %v3100_v26 = vld [vmem:[%s4036_s5 + $0x38] sm:$0xff] (!%p304_p10)   ;;  %v3101_v27 = vld [vmem:[%s4038_s7] sm:$0xff] (!%p304_p10)   ;;  %s3213_s28 = sshll.u32 (!%p304_p10), %s3291_s26, 4  ;;  %s3214_s28 = int_to_ptr.vmem [resolvable:$false] %s3213_s28 }
  0x14   : > { %2728 = vmatpush3.bf16.msra.mxu0 (!%p304_p10), %v3085_v2  ;;  %v3102_v28 = vld [vmem:[%s4038_s7 + $0x8] sm:$0xff] (!%p304_p10)   ;;  %v3103_v29 = vld [vmem:[%s4038_s7 + $0x10] sm:$0xff] (!%p304_p10)   ;;  %v3104_v30 = vld [vmem:[%s4038_s7 + $0x18] sm:$0xff] (!%p304_p10)  }
  0x15   : > { %2729 = vmatprep.subr.bf16.mxu0 (!%p304_p10), %v3289_v1  ;;  %v3105_v31 = vld [vmem:[%s4038_s7 + $0x20] sm:$0xff] (!%p304_p10)   ;;  %v3106_v32 = vld [vmem:[%s4038_s7 + $0x28] sm:$0xff] (!%p304_p10)   ;;  %v3107_v62 = vld [vmem:[%s4038_s7 + $0x30] sm:$0xff] (!%p304_p10)  }
  0x16   : > { %s4051_s27 = smov (!%p340_p11, %s2240_s27), 3  ;;  %2748 = vmatpush3.bf16.msra.mxu1 %v3094_v20  ;;  %v2252_v52 = vld [vmem:[%s4034_s3] ss:$0 sm:$0xff]  ;;  %v3108_v63 = vld [vmem:[%s4038_s7 + $0x38] sm:$0xff]   ;;  %v3110_v2 = vld [vmem:[%s4036_s5 + $0x48] sm:$0xff]  }
  0x17   : > { %s2241_s15 = sshll.u32 %s4051_s27, 2  ;;  %2749 = vmatprep.subr.bf16.mxu1 %v3289_v1  ;;  %v2253_v57 = vld [vmem:[%s4035_s4] ss:$0 sm:$0xff]  ;;  %v3118_v20 = vld [vmem:[%s4038_s7 + $0x48] sm:$0xff]   ;;  %s3215_s27 = scalar_lea.vmem %s3214_s28, 512 }
  0x18   : > { %s343_s20 = scalar_lea.vmem %s4031_s0, %s2241_s15  ;;  %2730 = vmatpush3.bf16.msra.mxu0 %v3086_v3  ;;  %v3109_v0 = vld [vmem:[%s4036_s5 + $0x40] sm:$0xff]   ;;  %v3111_v3 = vld [vmem:[%s4036_s5 + $0x50] sm:$0xff]   ;;  %s2164_s15 = sshll.u32 %s338_s29, 4  ;;  %s3978_s15 = int_to_ptr.vmem [resolvable:$true] %s2164_s15 }
  0x19   : > { %2731 = vmatprep.subr.bf16.mxu0 %v3289_v1  ;;  %v3092_v9 = vld [vmem:[%s343_s20] sm:$0xff]   ;;  %s3985_s20 = scalar_lea.sflag [#allocation4], %s336_s25  ;;  %s3209_s12 = scalar_lea.vmem %s3978_s15, 256 }
  0x1a   : > { %2750 = vmatpush3.bf16.msra.mxu1 %v3095_v21  ;;  %v3117_v19 = vld [vmem:[%s4038_s7 + $0x40] sm:$0xff]   ;;  %v3119_v21 = vld [vmem:[%s4038_s7 + $0x50] sm:$0xff]   ;;  %p3210_p12 = scmp.ne.s32.totalorder %s3978_s15, %s3209_s12  ;;  %p3216_p1 = scmp.lt.s32.totalorder %s3978_s15, %s3214_s28 }
  0x1b   : > { %2751 = vmatprep.subr.bf16.mxu1 %v3289_v1  ;;  %p3217_p2 = scmp.lt.s32.totalorder %s3215_s27, %s3209_s12 }
  0x1c   : > { %2732 = vmatpush3.bf16.msra.mxu0 %v3087_v4  ;;  %v3112_v4 = vld [vmem:[%s4036_s5 + $0x58] sm:$0xff]   ;;  %p3211_p13 = pnand %p3210_p12, %p3384_p4 }
  0x1d   : > { %2733 = vmatprep.subr.bf16.mxu0 %v3289_v1  ;;  %p3218_p3 = por %p3217_p2, %p3216_p1 }
  0x1e   : > { %2752 = vmatpush3.bf16.msra.mxu1 %v3096_v22  ;;  %v3120_v22 = vld [vmem:[%s4038_s7 + $0x58] sm:$0xff]   ;;  %p3212_p0 = pneg %p3211_p13 }
  0x1f   : > { %2753 = vmatprep.subr.bf16.mxu1 %v3289_v1 }
  0x20   : > { %2734 = vmatpush3.bf16.msra.mxu0 %v3088_v5  ;;  %v3113_v5 = vld [vmem:[%s4036_s5 + $0x60] sm:$0xff]   ;;  %p3219_p5 = pnand %p3218_p3, %p3212_p0 }
  0x21   : > { %2735 = vmatprep.subr.bf16.mxu0 %v3289_v1 }
  0x22   : > { %2754 = vmatpush3.bf16.msra.mxu1 %v3097_v23  ;;  %v3121_v23 = vld [vmem:[%s4038_s7 + $0x60] sm:$0xff]  }
  0x23   : > { %2755 = vmatprep.subr.bf16.mxu1 %v3289_v1 }
  0x24   : > { %2736 = vmatpush3.bf16.msra.mxu0 %v3089_v6  ;;  %v3114_v6 = vld [vmem:[%s4036_s5 + $0x68] sm:$0xff]  }
  0x25   : > { %2737 = vmatprep.subr.bf16.mxu0 %v3289_v1 }
  0x26   : > { %2756 = vmatpush3.bf16.msra.mxu1 %v3098_v24  ;;  %v3122_v24 = vld [vmem:[%s4038_s7 + $0x68] sm:$0xff]  }
  0x27   : > { %2757 = vmatprep.subr.bf16.mxu1 %v3289_v1 }
  0x28   : > { %2738 = vmatpush3.bf16.msra.mxu0 %v3090_v7  ;;  %v2254_v7 = vld [vmem:[%s4037_s6] ss:$0 sm:$0xff] }
  0x29   : > { %2739 = vmatprep.subr.bf16.mxu0 %v3289_v1 }
  0x2a   : > { %2758 = vmatpush3.bf16.msra.mxu1 %v3099_v25  ;;  %v2263_v25 = vld [vmem:[%s4039_s8] ss:$0 sm:$0xff] }
  0x2b   : > { %2759 = vmatprep.subr.bf16.mxu1 %v3289_v1 }
  0x2c   : > { %2740 = vmatpush3.bf16.msra.mxu0 %v3091_v8 }
  0x2d   : > { %2765 = vmatprep.subr.bf16.mxu0 %v3289_v1 }
  0x2e   : > { %2760 = vmatpush3.bf16.msra.mxu1 %v3100_v26 }
  0x2f   : > { %2742 = vmatmul.mubr.bf16.vlgmr.msra.gmra.mrb[0].mxu0 %v3092_v9  ;;  %2785 = vmatprep.subr.bf16.mxu1 %v3289_v1 }
  0x30   : > { %2781 = vmatprep.mubr.msk.bf16.mxu0 %vm3290_vm0, %v3289_v1  ;;  %2766 = vmatpush3.bf16.msra.mxu0 %v3101_v27 }
  0x31   : > { %2767 = vmatprep.subr.bf16.mxu0 %v3289_v1 }
  0x34   : > { %2768 = vmatpush3.bf16.msra.mxu0 %v3102_v28 }
  0x35   : > { %2769 = vmatprep.subr.bf16.mxu0 %v3289_v1 }
  0x38   : > { %2770 = vmatpush3.bf16.msra.mxu0 %v3103_v29 }
  0x39   : > { %2771 = vmatprep.subr.bf16.mxu0 %v3289_v1 }
  0x3c   : > { %2772 = vmatpush3.bf16.msra.mxu0 %v3104_v30 }
  0x3d   : > { %2773 = vmatprep.subr.bf16.mxu0 %v3289_v1 }
  0x40   : > { %2774 = vmatpush3.bf16.msra.mxu0 %v3105_v31 }
  0x41   : > { %2775 = vmatprep.subr.bf16.mxu0 %v3289_v1 }
  0x44   : > { %2776 = vmatpush3.bf16.msra.mxu0 %v3106_v32 }
  0x45   : > { %2777 = vmatprep.subr.bf16.mxu0 %v3289_v1 }
  0x48   : > { %2778 = vmatpush3.bf16.msra.mxu0 %v3107_v62 }
  0x49   : > { %2779 = vmatprep.subr.bf16.mxu0 %v3289_v1 }
  0x4c   : > { %2780 = vmatpush3.bf16.msra.mxu0 %v3108_v63 }
  0x4d   : > { %2805 = vmatprep.subr.bf16.mxu0 %v3289_v1 }
 0x102   : > { %v464_v11 = vpop.f32.mrb[0].mxu0 }
 0x103   : > { %v3446_v12 = vadd.f32 %v2242_v10, %v464_v11  ;;  %v2743_v13 = vpop.f32.mrb[1].mxu0 }
 0x104   : > { %v467_v14 = vpop.f32.mrb[2].mxu0 }
 0x105   : > { %v3448_v15 = vadd.f32 %v2242_v10, %v467_v14  ;;  %471 = vadd.xlane.f32.xlu0 %v3446_v12  ;;  %v2744_v16 = vpop.f32.mrb[3].mxu0  ;;  %v477_v17 = vmul.f32 %v3446_v12, %v3446_v12 }
 0x107   : > { %479 = vadd.xlane.f32.xlu1 %v477_v17  ;;  %v478_v18 = vmul.f32 %v3448_v15, %v3448_v15  ;;  %v3115_v17 = vld [vmem:[%s4036_s5 + $0x70] sm:$0xff]  }
 0x109   : > { %473 = vadd.xlane.f32.xlu0 %v3448_v15 }
 0x10b   : > { %481 = vadd.xlane.f32.xlu1 %v478_v18  ;;  %v3116_v18 = vld [vmem:[%s4036_s5 + $0x78] sm:$0xff]  }
 0x192   : > { %v472_v33 = vpop.xlane.xlu0 %471 }
 0x193   : > { %v475_v34 = vmul.f32 0.03125, %v472_v33  ;;  %v3123_v33 = vld [vmem:[%s4038_s7 + $0x70] sm:$0xff]  }
 0x194   : > { %v480_v35 = vpop.xlane.xlu1 %479 }
 0x195   : > { %v485_v36 = vmul.f32 %v475_v34, %v475_v34  ;;  %v483_v37 = vmul.f32 0.03125, %v480_v35  ;;  %v489_v49 = vsub.f32 %v3446_v12, %v475_v34  ;;  %v3124_v34 = vld [vmem:[%s4038_s7 + $0x78] sm:$0xff]   ;;  %v3125_v35 = vld [vmem:[%s4036_s5 + $0x80] sm:$0xff]  }
 0x196   : > { %v474_v38 = vpop.xlane.xlu0 %473 }
 0x197   : > { %v487_v39 = vsub.f32 %v483_v37, %v485_v36  ;;  %v476_v40 = vmul.f32 0.03125, %v474_v38  ;;  %v3126_v36 = vld [vmem:[%s4036_s5 + $0x88] sm:$0xff]   ;;  %v3127_v37 = vld [vmem:[%s4036_s5 + $0x90] sm:$0xff]   ;;  %v3128_v38 = vld [vmem:[%s4036_s5 + $0x98] sm:$0xff]  }
 0x198   : > { %v482_v41 = vpop.xlane.xlu1 %481 }
 0x199   : > { %v491_v42 = vmax.f32 %v487_v39, 0.0  ;;  %v486_v43 = vmul.f32 %v476_v40, %v476_v40  ;;  %v484_v44 = vmul.f32 0.03125, %v482_v41  ;;  %v490_v53 = vsub.f32 %v3448_v15, %v476_v40  ;;  %v3129_v39 = vld [vmem:[%s4036_s5 + $0xa0] sm:$0xff]   ;;  %v3130_v40 = vld [vmem:[%s4036_s5 + $0xa8] sm:$0xff]  }
 0x19a   : > { %v2289_v41 = vld [vmem:[%s4037_s6 + $0x1] ss:$0 sm:$0xff] }
 0x19b   : > { %v493_v45 = vadd.f32 1e-05, %v491_v42  ;;  %v488_v46 = vsub.f32 %v484_v44, %v486_v43 }
 0x19d   : > { %3205 = vrsqrt.f32 %v493_v45  ;;  %v492_v47 = vmax.f32 %v488_v46, 0.0 }
 0x19f   : > { %v494_v48 = vadd.f32 1e-05, %v492_v47 }
 0x1a1   : > { %3207 = vrsqrt.f32 %v494_v48 }
 0x1a7   : > { %v3206_v50 = vpop.eup %3205 }
 0x1a8   : > { %v497_v51 = vmul.f32 %v3206_v50, %v489_v49 }
 0x1aa   : > { %v506_v56 = vmul.f32 %v2252_v52, %v497_v51  ;;  %v3131_v51 = vld [vmem:[%s4036_s5 + $0xb0] sm:$0xff]  }
 0x1ab   : > { %v3208_v54 = vpop.eup %3207 }
 0x1ac   : > { %v498_v55 = vmul.f32 %v3208_v54, %v490_v53  ;;  %v515_v59 = vadd.f32 %v2253_v57, %v506_v56  ;;  %v3133_v53 = vld [vmem:[%s4038_s7 + $0x80] sm:$0xff]   ;;  %v3134_v54 = vld [vmem:[%s4038_s7 + $0x88] sm:$0xff]   ;;  %v3136_v56 = vld [vmem:[%s4038_s7 + $0x98] sm:$0xff]  }
 0x1ae   : > { %v507_v58 = vmul.f32 %v2252_v52, %v498_v55  ;;  %v3132_v52 = vld [vmem:[%s4036_s5 + $0xb8] sm:$0xff]   ;;  %v3135_v55 = vld [vmem:[%s4038_s7 + $0x90] sm:$0xff]  }
 0x1b0   : > { %v516_v60 = vadd.f32 %v2253_v57, %v507_v58  ;;  %v3137_v57 = vld [vmem:[%s4038_s7 + $0xa0] sm:$0xff]   ;;  %v3138_v58 = vld [vmem:[%s4038_s7 + $0xa8] sm:$0xff]  }
 0x1b2   : > { %v517_v61 = vpack.c.bf16 %v516_v60, %v515_v59  ;;  %v2315_v59 = vld [vmem:[%s4039_s8 + $0x1] ss:$0 sm:$0xff] }
 0x1b4   : > { %2762 = vmatmul.mubr.bf16.vlgmr.msra.gmra.mrb[0].mxu1 %v517_v61 }
 0x1b5   : > { %2801 = vmatprep.mubr.msk.bf16.mxu1 %vm3290_vm0, %v3289_v1  ;;  %2786 = vmatpush3.bf16.msra.mxu1 %v3109_v0 }
 0x1b6   : > { %2787 = vmatprep.subr.bf16.mxu1 %v3289_v1 }
 0x1b9   : > { %2788 = vmatpush3.bf16.msra.mxu1 %v3110_v2 }
 0x1ba   : > { %2789 = vmatprep.subr.bf16.mxu1 %v3289_v1 }
 0x1bd   : > { %2790 = vmatpush3.bf16.msra.mxu1 %v3111_v3 }
 0x1be   : > { %2791 = vmatprep.subr.bf16.mxu1 %v3289_v1 }
 0x1c1   : > { %2792 = vmatpush3.bf16.msra.mxu1 %v3112_v4  ;;  %v3139_v4 = vld [vmem:[%s4038_s7 + $0xb0] sm:$0xff]  }
 0x1c2   : > { %2793 = vmatprep.subr.bf16.mxu1 %v3289_v1 }
 0x1c5   : > { %2794 = vmatpush3.bf16.msra.mxu1 %v3113_v5  ;;  %v3140_v5 = vld [vmem:[%s4038_s7 + $0xb8] sm:$0xff]  }
 0x1c6   : > { %2795 = vmatprep.subr.bf16.mxu1 %v3289_v1 }
 0x1c9   : > { %2796 = vmatpush3.bf16.msra.mxu1 %v3114_v6  ;;  %v3141_v6 = vld [vmem:[%s4036_s5 + $0xc0] sm:$0xff]  }
 0x1ca   : > { %2797 = vmatprep.subr.bf16.mxu1 %v3289_v1 }
 0x1cd   : > { %2798 = vmatpush3.bf16.msra.mxu1 %v3115_v17 }
 0x1ce   : > { %2799 = vmatprep.subr.bf16.mxu1 %v3289_v1 }
 0x1d1   : > { %2800 = vmatpush3.bf16.msra.mxu1 %v3116_v18 }
 0x1d2   : > { %2825 = vmatprep.subr.bf16.mxu1 %v3289_v1 }
 0x287   : > { %v625_v8 = vpop.f32.mrb[0].mxu1 }
 0x288   : > { %v626_v9 = vadd.f32 %v2254_v7, %v625_v8  ;;  %v2763_v10 = vpop.f32.mrb[1].mxu1  ;;  %v3143_v8 = vld [vmem:[%s4036_s5 + $0xd0] sm:$0xff]  }
 0x289   : > { %v628_v11 = vpop.f32.mrb[2].mxu1  ;;  %v3145_v10 = vld [vmem:[%s4036_s5 + $0xe0] sm:$0xff]  }
 0x28a   : > { %v629_v12 = vadd.f32 %v2254_v7, %v628_v11  ;;  %v2764_v13 = vpop.f32.mrb[3].mxu1  ;;  %v632_v14 = vmax.f32 %v626_v9, 0.0  ;;  %v3142_v7 = vld [vmem:[%s4036_s5 + $0xc8] sm:$0xff]   ;;  %v3144_v9 = vld [vmem:[%s4036_s5 + $0xd8] sm:$0xff]  }
 0x28b   : > { %v3146_v11 = vld [vmem:[%s4036_s5 + $0xe8] sm:$0xff]  }
 0x28c   : > { %v633_v15 = vmax.f32 %v629_v12, 0.0  ;;  %v2341_v12 = vld [vmem:[%s4037_s6 + $0x2] ss:$0 sm:$0xff] }
 0x28e   : > { %v634_v16 = vpack.c.bf16 %v633_v15, %v632_v14 }
 0x290   : > { %2782 = vmatmul.mubr.bf16.vlgmr.msra.gmra.mrb[4].mxu0 %v634_v16 }
 0x291   : > { %2821 = vmatprep.mubr.msk.bf16.mxu0 %vm3290_vm0, %v3289_v1  ;;  %2806 = vmatpush3.bf16.msra.mxu0 %v3117_v19 }
 0x292   : > { %2807 = vmatprep.subr.bf16.mxu0 %v3289_v1 }
 0x295   : > { %2808 = vmatpush3.bf16.msra.mxu0 %v3118_v20 }
 0x296   : > { %2809 = vmatprep.subr.bf16.mxu0 %v3289_v1 }
 0x299   : > { %2810 = vmatpush3.bf16.msra.mxu0 %v3119_v21 }
 0x29a   : > { %2811 = vmatprep.subr.bf16.mxu0 %v3289_v1 }
 0x29d   : > { %2812 = vmatpush3.bf16.msra.mxu0 %v3120_v22  ;;  %v3147_v22 = vld [vmem:[%s4036_s5 + $0xf0] sm:$0xff]  }
 0x29e   : > { %2813 = vmatprep.subr.bf16.mxu0 %v3289_v1 }
 0x2a1   : > { %2814 = vmatpush3.bf16.msra.mxu0 %v3121_v23  ;;  %v3148_v23 = vld [vmem:[%s4036_s5 + $0xf8] sm:$0xff]  }
 0x2a2   : > { %2815 = vmatprep.subr.bf16.mxu0 %v3289_v1 }
 0x2a5   : > { %2816 = vmatpush3.bf16.msra.mxu0 %v3122_v24  ;;  %v3149_v24 = vld [vmem:[%s4038_s7 + $0xc0] sm:$0xff]  }
 0x2a6   : > { %2817 = vmatprep.subr.bf16.mxu0 %v3289_v1 }
 0x2a9   : > { %2818 = vmatpush3.bf16.msra.mxu0 %v3123_v33 }
 0x2aa   : > { %2819 = vmatprep.subr.bf16.mxu0 %v3289_v1 }
 0x2ad   : > { %2820 = vmatpush3.bf16.msra.mxu0 %v3124_v34 }
 0x2ae   : > { %2845 = vmatprep.subr.bf16.mxu0 %v3289_v1 }
 0x363   : > { %v740_v26 = vpop.f32.mrb[4].mxu0 }
 0x364   : > { %v2783_v27 = vpop.f32.mrb[5].mxu0  ;;  %v741_v29 = vadd.f32 %v2263_v25, %v740_v26  ;;  %v3151_v26 = vld [vmem:[%s4038_s7 + $0xd0] sm:$0xff]  }
 0x365   : > { %v743_v28 = vpop.f32.mrb[6].mxu0  ;;  %v3152_v27 = vld [vmem:[%s4038_s7 + $0xd8] sm:$0xff]  }
 0x366   : > { %v744_v30 = vadd.f32 %v2263_v25, %v743_v28  ;;  %v2784_v31 = vpop.f32.mrb[7].mxu0  ;;  %v3150_v25 = vld [vmem:[%s4038_s7 + $0xc8] sm:$0xff]   ;;  %v3153_v28 = vld [vmem:[%s4038_s7 + $0xe0] sm:$0xff]  }
 0x368   : > { %v747_v32 = vpack.c.bf16 %v744_v30, %v741_v29  ;;  %v3154_v29 = vld [vmem:[%s4038_s7 + $0xe8] sm:$0xff]   ;;  %v2367_v30 = vld [vmem:[%s4039_s8 + $0x2] ss:$0 sm:$0xff] }
 0x36a   : > { %2802 = vmatmul.mubr.bf16.vlgmr.msra.gmra.mrb[4].mxu1 %v747_v32 }
 0x36b   : > { %2841 = vmatprep.mubr.msk.bf16.mxu1 %vm3290_vm0, %v3289_v1  ;;  %2826 = vmatpush3.bf16.msra.mxu1 %v3125_v35 }
 0x36c   : > { %2827 = vmatprep.subr.bf16.mxu1 %v3289_v1 }
 0x36f   : > { %2828 = vmatpush3.bf16.msra.mxu1 %v3126_v36 }
 0x370   : > { %2829 = vmatprep.subr.bf16.mxu1 %v3289_v1 }
 0x373   : > { %2830 = vmatpush3.bf16.msra.mxu1 %v3127_v37 }
 0x374   : > { %2831 = vmatprep.subr.bf16.mxu1 %v3289_v1 }
 0x377   : > { %2832 = vmatpush3.bf16.msra.mxu1 %v3128_v38  ;;  %v3155_v38 = vld [vmem:[%s4038_s7 + $0xf0] sm:$0xff]  }
 0x378   : > { %2833 = vmatprep.subr.bf16.mxu1 %v3289_v1 }
 0x37b   : > { %2834 = vmatpush3.bf16.msra.mxu1 %v3129_v39  ;;  %v3156_v39 = vld [vmem:[%s4038_s7 + $0xf8] sm:$0xff]  }
 0x37c   : > { %2835 = vmatprep.subr.bf16.mxu1 %v3289_v1 }
 0x37f   : > { %2836 = vmatpush3.bf16.msra.mxu1 %v3130_v40  ;;  %v3157_v40 = vld [vmem:[%s4036_s5 + $0x100] sm:$0xff]  }
 0x380   : > { %2837 = vmatprep.subr.bf16.mxu1 %v3289_v1 }
 0x383   : > { %2838 = vmatpush3.bf16.msra.mxu1 %v3131_v51 }
 0x384   : > { %2839 = vmatprep.subr.bf16.mxu1 %v3289_v1 }
 0x387   : > { %2840 = vmatpush3.bf16.msra.mxu1 %v3132_v52 }
 0x388   : > { %2865 = vmatprep.subr.bf16.mxu1 %v3289_v1 }
 0x43d   : > { %v855_v42 = vpop.f32.mrb[4].mxu1 }
 0x43e   : > { %v856_v43 = vadd.f32 %v2289_v41, %v855_v42  ;;  %v2803_v44 = vpop.f32.mrb[5].mxu1  ;;  %v3159_v42 = vld [vmem:[%s4036_s5 + $0x110] sm:$0xff]  }
 0x43f   : > { %v858_v45 = vpop.f32.mrb[6].mxu1  ;;  %v3161_v44 = vld [vmem:[%s4036_s5 + $0x120] sm:$0xff]  }
 0x440   : > { %v859_v46 = vadd.f32 %v2289_v41, %v858_v45  ;;  %v2804_v47 = vpop.f32.mrb[7].mxu1  ;;  %v862_v48 = vmax.f32 %v856_v43, 0.0  ;;  %v3158_v41 = vld [vmem:[%s4036_s5 + $0x108] sm:$0xff]   ;;  %v3160_v43 = vld [vmem:[%s4036_s5 + $0x118] sm:$0xff]  }
 0x441   : > { %v3162_v45 = vld [vmem:[%s4036_s5 + $0x128] sm:$0xff]  }
 0x442   : > { %v863_v49 = vmax.f32 %v859_v46, 0.0  ;;  %v2393_v46 = vld [vmem:[%s4037_s6 + $0x3] ss:$0 sm:$0xff] }
 0x444   : > { %v864_v50 = vpack.c.bf16 %v863_v49, %v862_v48 }
 0x446   : > { %2822 = vmatmul.mubr.bf16.vlgmr.msra.gmra.mrb[8].mxu0 %v864_v50 }
 0x447   : > { %2861 = vmatprep.mubr.msk.bf16.mxu0 %vm3290_vm0, %v3289_v1  ;;  %2846 = vmatpush3.bf16.msra.mxu0 %v3133_v53 }
 0x448   : > { %2847 = vmatprep.subr.bf16.mxu0 %v3289_v1 }
 0x44b   : > { %2848 = vmatpush3.bf16.msra.mxu0 %v3134_v54 }
 0x44c   : > { %2849 = vmatprep.subr.bf16.mxu0 %v3289_v1 }
 0x44f   : > { %2850 = vmatpush3.bf16.msra.mxu0 %v3135_v55 }
 0x450   : > { %2851 = vmatprep.subr.bf16.mxu0 %v3289_v1 }
 0x453   : > { %2852 = vmatpush3.bf16.msra.mxu0 %v3136_v56  ;;  %v3163_v56 = vld [vmem:[%s4036_s5 + $0x130] sm:$0xff]  }
 0x454   : > { %2853 = vmatprep.subr.bf16.mxu0 %v3289_v1 }
 0x457   : > { %2854 = vmatpush3.bf16.msra.mxu0 %v3137_v57  ;;  %v3164_v57 = vld [vmem:[%s4036_s5 + $0x138] sm:$0xff]  }
 0x458   : > { %2855 = vmatprep.subr.bf16.mxu0 %v3289_v1 }
 0x45b   : > { %2856 = vmatpush3.bf16.msra.mxu0 %v3138_v58  ;;  %v3165_v58 = vld [vmem:[%s4038_s7 + $0x100] sm:$0xff]  }
 0x45c   : > { %2857 = vmatprep.subr.bf16.mxu0 %v3289_v1 }
 0x45f   : > { %2858 = vmatpush3.bf16.msra.mxu0 %v3139_v4 }
 0x460   : > { %2859 = vmatprep.subr.bf16.mxu0 %v3289_v1 }
 0x463   : > { %2860 = vmatpush3.bf16.msra.mxu0 %v3140_v5 }
 0x464   : > { %2885 = vmatprep.subr.bf16.mxu0 %v3289_v1 }
 0x519   : > { %v972_v60 = vpop.f32.mrb[8].mxu0 }
 0x51a   : > { %v2823_v61 = vpop.f32.mrb[9].mxu0  ;;  %v973_v63 = vadd.f32 %v2315_v59, %v972_v60  ;;  %v3167_v60 = vld [vmem:[%s4038_s7 + $0x110] sm:$0xff]  }
 0x51b   : > { %v975_v62 = vpop.f32.mrb[10].mxu0  ;;  %v3168_v61 = vld [vmem:[%s4038_s7 + $0x118] sm:$0xff]  }
 0x51c   : > { %v976_v0 = vadd.f32 %v2315_v59, %v975_v62  ;;  %v2824_v2 = vpop.f32.mrb[11].mxu0  ;;  %v3166_v59 = vld [vmem:[%s4038_s7 + $0x108] sm:$0xff]   ;;  %v3169_v62 = vld [vmem:[%s4038_s7 + $0x120] sm:$0xff]  }
 0x51e   : > { %v979_v3 = vpack.c.bf16 %v976_v0, %v973_v63  ;;  %v3170_v63 = vld [vmem:[%s4038_s7 + $0x128] sm:$0xff]   ;;  %v2419_v0 = vld [vmem:[%s4039_s8 + $0x3] ss:$0 sm:$0xff] }
 0x520   : > { %2842 = vmatmul.mubr.bf16.vlgmr.msra.gmra.mrb[8].mxu1 %v979_v3 }
 0x521   : > { %2881 = vmatprep.mubr.msk.bf16.mxu1 %vm3290_vm0, %v3289_v1  ;;  %2866 = vmatpush3.bf16.msra.mxu1 %v3141_v6 }
 0x522   : > { %2867 = vmatprep.subr.bf16.mxu1 %v3289_v1 }
 0x525   : > { %2868 = vmatpush3.bf16.msra.mxu1 %v3142_v7 }
 0x526   : > { %2869 = vmatprep.subr.bf16.mxu1 %v3289_v1 }
 0x529   : > { %2870 = vmatpush3.bf16.msra.mxu1 %v3143_v8 }
 0x52a   : > { %2871 = vmatprep.subr.bf16.mxu1 %v3289_v1 }
 0x52d   : > { %2872 = vmatpush3.bf16.msra.mxu1 %v3144_v9  ;;  %v3171_v9 = vld [vmem:[%s4038_s7 + $0x130] sm:$0xff]  }
 0x52e   : > { %2873 = vmatprep.subr.bf16.mxu1 %v3289_v1 }
 0x531   : > { %2874 = vmatpush3.bf16.msra.mxu1 %v3145_v10  ;;  %v3172_v10 = vld [vmem:[%s4038_s7 + $0x138] sm:$0xff]  }
 0x532   : > { %2875 = vmatprep.subr.bf16.mxu1 %v3289_v1 }
 0x535   : > { %2876 = vmatpush3.bf16.msra.mxu1 %v3146_v11  ;;  %v3173_v11 = vld [vmem:[%s4036_s5 + $0x140] sm:$0xff]  }
 0x536   : > { %2877 = vmatprep.subr.bf16.mxu1 %v3289_v1 }
 0x539   : > { %2878 = vmatpush3.bf16.msra.mxu1 %v3147_v22 }
 0x53a   : > { %2879 = vmatprep.subr.bf16.mxu1 %v3289_v1 }
 0x53d   : > { %2880 = vmatpush3.bf16.msra.mxu1 %v3148_v23 }
 0x53e   : > { %2905 = vmatprep.subr.bf16.mxu1 %v3289_v1 }
 0x5f3   : > { %v1087_v13 = vpop.f32.mrb[8].mxu1 }
 0x5f4   : > { %v1088_v14 = vadd.f32 %v2341_v12, %v1087_v13  ;;  %v2843_v15 = vpop.f32.mrb[9].mxu1  ;;  %v3175_v13 = vld [vmem:[%s4036_s5 + $0x150] sm:$0xff]  }
 0x5f5   : > { %v1090_v16 = vpop.f32.mrb[10].mxu1  ;;  %v3177_v15 = vld [vmem:[%s4036_s5 + $0x160] sm:$0xff]  }
 0x5f6   : > { %v1091_v17 = vadd.f32 %v2341_v12, %v1090_v16  ;;  %v2844_v18 = vpop.f32.mrb[11].mxu1  ;;  %v1094_v19 = vmax.f32 %v1088_v14, 0.0  ;;  %v3174_v12 = vld [vmem:[%s4036_s5 + $0x148] sm:$0xff]   ;;  %v3176_v14 = vld [vmem:[%s4036_s5 + $0x158] sm:$0xff]  }
 0x5f7   : > { %v3178_v16 = vld [vmem:[%s4036_s5 + $0x168] sm:$0xff]  }
 0x5f8   : > { %v1095_v20 = vmax.f32 %v1091_v17, 0.0  ;;  %v2445_v17 = vld [vmem:[%s4037_s6 + $0x4] ss:$0 sm:$0xff] }
 0x5fa   : > { %v1096_v21 = vpack.c.bf16 %v1095_v20, %v1094_v19 }
 0x5fc   : > { %2862 = vmatmul.mubr.bf16.vlgmr.msra.gmra.mrb[12].mxu0 %v1096_v21 }
 0x5fd   : > { %2901 = vmatprep.mubr.msk.bf16.mxu0 %vm3290_vm0, %v3289_v1  ;;  %2886 = vmatpush3.bf16.msra.mxu0 %v3149_v24 }
 0x5fe   : > { %2887 = vmatprep.subr.bf16.mxu0 %v3289_v1 }
 0x601   : > { %2888 = vmatpush3.bf16.msra.mxu0 %v3150_v25 }
 0x602   : > { %2889 = vmatprep.subr.bf16.mxu0 %v3289_v1 }
 0x605   : > { %2890 = vmatpush3.bf16.msra.mxu0 %v3151_v26 }
 0x606   : > { %2891 = vmatprep.subr.bf16.mxu0 %v3289_v1 }
 0x609   : > { %2892 = vmatpush3.bf16.msra.mxu0 %v3152_v27  ;;  %v3179_v27 = vld [vmem:[%s4036_s5 + $0x170] sm:$0xff]  }
 0x60a   : > { %2893 = vmatprep.subr.bf16.mxu0 %v3289_v1 }
 0x60d   : > { %2894 = vmatpush3.bf16.msra.mxu0 %v3153_v28  ;;  %v3180_v28 = vld [vmem:[%s4036_s5 + $0x178] sm:$0xff]  }
 0x60e   : > { %2895 = vmatprep.subr.bf16.mxu0 %v3289_v1 }
 0x611   : > { %2896 = vmatpush3.bf16.msra.mxu0 %v3154_v29  ;;  %v3181_v29 = vld [vmem:[%s4038_s7 + $0x140] sm:$0xff]  }
 0x612   : > { %2897 = vmatprep.subr.bf16.mxu0 %v3289_v1 }
 0x615   : > { %2898 = vmatpush3.bf16.msra.mxu0 %v3155_v38 }
 0x616   : > { %2899 = vmatprep.subr.bf16.mxu0 %v3289_v1 }
 0x619   : > { %2900 = vmatpush3.bf16.msra.mxu0 %v3156_v39 }
 0x61a   : > { %2925 = vmatprep.subr.bf16.mxu0 %v3289_v1 }
 0x6cf   : > { %v1204_v31 = vpop.f32.mrb[12].mxu0 }
 0x6d0   : > { %v2863_v32 = vpop.f32.mrb[13].mxu0  ;;  %v1205_v34 = vadd.f32 %v2367_v30, %v1204_v31  ;;  %v3183_v31 = vld [vmem:[%s4038_s7 + $0x150] sm:$0xff]  }
 0x6d1   : > { %v1207_v33 = vpop.f32.mrb[14].mxu0  ;;  %v3184_v32 = vld [vmem:[%s4038_s7 + $0x158] sm:$0xff]  }
 0x6d2   : > { %v1208_v35 = vadd.f32 %v2367_v30, %v1207_v33  ;;  %v2864_v36 = vpop.f32.mrb[15].mxu0  ;;  %v3182_v30 = vld [vmem:[%s4038_s7 + $0x148] sm:$0xff]   ;;  %v3185_v33 = vld [vmem:[%s4038_s7 + $0x160] sm:$0xff]  }
 0x6d4   : > { %v1211_v37 = vpack.c.bf16 %v1208_v35, %v1205_v34  ;;  %v3186_v34 = vld [vmem:[%s4038_s7 + $0x168] sm:$0xff]   ;;  %v2471_v35 = vld [vmem:[%s4039_s8 + $0x4] ss:$0 sm:$0xff] }
 0x6d6   : > { %2882 = vmatmul.mubr.bf16.vlgmr.msra.gmra.mrb[12].mxu1 %v1211_v37 }
 0x6d7   : > { %2921 = vmatprep.mubr.msk.bf16.mxu1 %vm3290_vm0, %v3289_v1  ;;  %2906 = vmatpush3.bf16.msra.mxu1 %v3157_v40 }
 0x6d8   : > { %2907 = vmatprep.subr.bf16.mxu1 %v3289_v1 }
 0x6db   : > { %2908 = vmatpush3.bf16.msra.mxu1 %v3158_v41 }
 0x6dc   : > { %2909 = vmatprep.subr.bf16.mxu1 %v3289_v1 }
 0x6df   : > { %2910 = vmatpush3.bf16.msra.mxu1 %v3159_v42 }
 0x6e0   : > { %2911 = vmatprep.subr.bf16.mxu1 %v3289_v1 }
 0x6e3   : > { %2912 = vmatpush3.bf16.msra.mxu1 %v3160_v43  ;;  %v3187_v43 = vld [vmem:[%s4038_s7 + $0x170] sm:$0xff]  }
 0x6e4   : > { %2913 = vmatprep.subr.bf16.mxu1 %v3289_v1 }
 0x6e7   : > { %2914 = vmatpush3.bf16.msra.mxu1 %v3161_v44  ;;  %v3188_v44 = vld [vmem:[%s4038_s7 + $0x178] sm:$0xff]  }
 0x6e8   : > { %2915 = vmatprep.subr.bf16.mxu1 %v3289_v1 }
 0x6eb   : > { %2916 = vmatpush3.bf16.msra.mxu1 %v3162_v45  ;;  %v3189_v45 = vld [vmem:[%s4036_s5 + $0x180] sm:$0xff]  }
 0x6ec   : > { %2917 = vmatprep.subr.bf16.mxu1 %v3289_v1 }
 0x6ef   : > { %2918 = vmatpush3.bf16.msra.mxu1 %v3163_v56 }
 0x6f0   : > { %2919 = vmatprep.subr.bf16.mxu1 %v3289_v1 }
 0x6f3   : > { %2920 = vmatpush3.bf16.msra.mxu1 %v3164_v57 }
 0x6f4   : > { %2945 = vmatprep.subr.bf16.mxu1 %v3289_v1 }
 0x7a9   : > { %v1319_v47 = vpop.f32.mrb[12].mxu1 }
 0x7aa   : > { %v1320_v48 = vadd.f32 %v2393_v46, %v1319_v47  ;;  %v2883_v49 = vpop.f32.mrb[13].mxu1  ;;  %v3191_v47 = vld [vmem:[%s4036_s5 + $0x190] sm:$0xff]  }
 0x7ab   : > { %v1322_v50 = vpop.f32.mrb[14].mxu1  ;;  %v3193_v49 = vld [vmem:[%s4036_s5 + $0x1a0] sm:$0xff]  }
 0x7ac   : > { %v1323_v51 = vadd.f32 %v2393_v46, %v1322_v50  ;;  %v2884_v52 = vpop.f32.mrb[15].mxu1  ;;  %v1326_v53 = vmax.f32 %v1320_v48, 0.0  ;;  %v3190_v46 = vld [vmem:[%s4036_s5 + $0x188] sm:$0xff]   ;;  %v3192_v48 = vld [vmem:[%s4036_s5 + $0x198] sm:$0xff]  }
 0x7ad   : > { %v3194_v50 = vld [vmem:[%s4036_s5 + $0x1a8] sm:$0xff]  }
 0x7ae   : > { %v1327_v54 = vmax.f32 %v1323_v51, 0.0  ;;  %v2497_v51 = vld [vmem:[%s4037_s6 + $0x5] ss:$0 sm:$0xff] }
 0x7b0   : > { %v1328_v55 = vpack.c.bf16 %v1327_v54, %v1326_v53 }
 0x7b2   : > { %2902 = vmatmul.mubr.bf16.vlgmr.msra.gmra.mrb[16].mxu0 %v1328_v55 }
 0x7b3   : > { %2941 = vmatprep.mubr.msk.bf16.mxu0 %vm3290_vm0, %v3289_v1  ;;  %2926 = vmatpush3.bf16.msra.mxu0 %v3165_v58 }
 0x7b4   : > { %2927 = vmatprep.subr.bf16.mxu0 %v3289_v1 }
 0x7b7   : > { %2928 = vmatpush3.bf16.msra.mxu0 %v3166_v59 }
 0x7b8   : > { %2929 = vmatprep.subr.bf16.mxu0 %v3289_v1 }
 0x7bb   : > { %2930 = vmatpush3.bf16.msra.mxu0 %v3167_v60 }
 0x7bc   : > { %2931 = vmatprep.subr.bf16.mxu0 %v3289_v1 }
 0x7bf   : > { %2932 = vmatpush3.bf16.msra.mxu0 %v3168_v61  ;;  %v3195_v61 = vld [vmem:[%s4036_s5 + $0x1b0] sm:$0xff]  }
 0x7c0   : > { %2933 = vmatprep.subr.bf16.mxu0 %v3289_v1 }
 0x7c3   : > { %2934 = vmatpush3.bf16.msra.mxu0 %v3169_v62  ;;  %v3196_v62 = vld [vmem:[%s4036_s5 + $0x1b8] sm:$0xff]  }
 0x7c4   : > { %2935 = vmatprep.subr.bf16.mxu0 %v3289_v1 }
 0x7c7   : > { %2936 = vmatpush3.bf16.msra.mxu0 %v3170_v63  ;;  %v3197_v63 = vld [vmem:[%s4038_s7 + $0x180] sm:$0xff]  }
 0x7c8   : > { %2937 = vmatprep.subr.bf16.mxu0 %v3289_v1 }
 0x7cb   : > { %2938 = vmatpush3.bf16.msra.mxu0 %v3171_v9 }
 0x7cc   : > { %2939 = vmatprep.subr.bf16.mxu0 %v3289_v1 }
 0x7cf   : > { %2940 = vmatpush3.bf16.msra.mxu0 %v3172_v10 }
 0x7d0   : > { %2965 = vmatprep.subr.bf16.mxu0 %v3289_v1 }
 0x885   : > { %v1436_v2 = vpop.f32.mrb[16].mxu0 }
 0x886   : > { %v2903_v3 = vpop.f32.mrb[17].mxu0  ;;  %v1437_v5 = vadd.f32 %v2419_v0, %v1436_v2  ;;  %v3199_v2 = vld [vmem:[%s4038_s7 + $0x190] sm:$0xff]  }
 0x887   : > { %v1439_v4 = vpop.f32.mrb[18].mxu0  ;;  %v3200_v3 = vld [vmem:[%s4038_s7 + $0x198] sm:$0xff]  }
 0x888   : > { %v1440_v6 = vadd.f32 %v2419_v0, %v1439_v4  ;;  %v2904_v7 = vpop.f32.mrb[19].mxu0  ;;  %v3198_v0 = vld [vmem:[%s4038_s7 + $0x188] sm:$0xff]   ;;  %v3201_v4 = vld [vmem:[%s4038_s7 + $0x1a0] sm:$0xff]  }
 0x88a   : > { %v1443_v8 = vpack.c.bf16 %v1440_v6, %v1437_v5  ;;  %v3202_v5 = vld [vmem:[%s4038_s7 + $0x1a8] sm:$0xff]   ;;  %v2523_v6 = vld [vmem:[%s4039_s8 + $0x5] ss:$0 sm:$0xff] }
 0x88c   : > { %2922 = vmatmul.mubr.bf16.vlgmr.msra.gmra.mrb[16].mxu1 %v1443_v8 }
 0x88d   : > { %2961 = vmatprep.mubr.msk.bf16.mxu1 %vm3290_vm0, %v3289_v1  ;;  %2946 = vmatpush3.bf16.msra.mxu1 %v3173_v11 }
 0x88e   : > { %2947 = vmatprep.subr.bf16.mxu1 %v3289_v1 }
 0x891   : > { %2948 = vmatpush3.bf16.msra.mxu1 %v3174_v12 }
 0x892   : > { %2949 = vmatprep.subr.bf16.mxu1 %v3289_v1 }
 0x895   : > { %2950 = vmatpush3.bf16.msra.mxu1 %v3175_v13 }
 0x896   : > { %2951 = vmatprep.subr.bf16.mxu1 %v3289_v1 }
 0x899   : > { %2952 = vmatpush3.bf16.msra.mxu1 %v3176_v14  ;;  %v3203_v14 = vld [vmem:[%s4038_s7 + $0x1b0] sm:$0xff]  }
 0x89a   : > { %2953 = vmatprep.subr.bf16.mxu1 %v3289_v1 }
 0x89d   : > { %2954 = vmatpush3.bf16.msra.mxu1 %v3177_v15  ;;  %v3204_v15 = vld [vmem:[%s4038_s7 + $0x1b8] sm:$0xff]  }
 0x89e   : > { %2955 = vmatprep.subr.bf16.mxu1 %v3289_v1 }
 0x8a1   : > { %2956 = vmatpush3.bf16.msra.mxu1 %v3178_v16  ;;  %v2549_v16 = vld [vmem:[%s4037_s6 + $0x6] ss:$0 sm:$0xff] }
 0x8a2   : > { %2957 = vmatprep.subr.bf16.mxu1 %v3289_v1 }
 0x8a5   : > { %2958 = vmatpush3.bf16.msra.mxu1 %v3179_v27 }
 0x8a6   : > { %2959 = vmatprep.subr.bf16.mxu1 %v3289_v1 }
 0x8a9   : > { %2960 = vmatpush3.bf16.msra.mxu1 %v3180_v28 }
 0x8aa   : > { %2985 = vmatprep.subr.bf16.mxu1 %v3289_v1 }
 0x95f   : > { %v1551_v18 = vpop.f32.mrb[16].mxu1 }
 0x960   : > { %v1552_v19 = vadd.f32 %v2445_v17, %v1551_v18  ;;  %v2923_v20 = vpop.f32.mrb[17].mxu1 }
 0x961   : > { %v1554_v21 = vpop.f32.mrb[18].mxu1 }
 0x962   : > { %v1555_v22 = vadd.f32 %v2445_v17, %v1554_v21  ;;  %v2924_v23 = vpop.f32.mrb[19].mxu1  ;;  %v1558_v24 = vmax.f32 %v1552_v19, 0.0 }
 0x964   : > { %v1559_v25 = vmax.f32 %v1555_v22, 0.0 }
 0x966   : > { %v1560_v26 = vpack.c.bf16 %v1559_v25, %v1558_v24 }
 0x968   : > { %2942 = vmatmul.mubr.bf16.vlgmr.msra.gmra.mrb[20].mxu0 %v1560_v26 }
 0x969   : > { %2981 = vmatprep.mubr.msk.bf16.mxu0 %vm3290_vm0, %v3289_v1  ;;  %2966 = vmatpush3.bf16.msra.mxu0 %v3181_v29 }
 0x96a   : > { %2967 = vmatprep.subr.bf16.mxu0 %v3289_v1 }
 0x96d   : > { %2968 = vmatpush3.bf16.msra.mxu0 %v3182_v30 }
 0x96e   : > { %2969 = vmatprep.subr.bf16.mxu0 %v3289_v1 }
 0x971   : > { %2970 = vmatpush3.bf16.msra.mxu0 %v3183_v31 }
 0x972   : > { %2971 = vmatprep.subr.bf16.mxu0 %v3289_v1 }
 0x975   : > { %2972 = vmatpush3.bf16.msra.mxu0 %v3184_v32 }
 0x976   : > { %2973 = vmatprep.subr.bf16.mxu0 %v3289_v1 }
 0x979   : > { %2974 = vmatpush3.bf16.msra.mxu0 %v3185_v33 }
 0x97a   : > { %2975 = vmatprep.subr.bf16.mxu0 %v3289_v1 }
 0x97d   : > { %2976 = vmatpush3.bf16.msra.mxu0 %v3186_v34 }
 0x97e   : > { %2977 = vmatprep.subr.bf16.mxu0 %v3289_v1 }
 0x981   : > { %2978 = vmatpush3.bf16.msra.mxu0 %v3187_v43 }
 0x982   : > { %2979 = vmatprep.subr.bf16.mxu0 %v3289_v1 }
 0x985   : > { %2980 = vmatpush3.bf16.msra.mxu0 %v3188_v44 }
 0x986   : > { %3005 = vmatprep.subr.bf16.mxu0 %v3289_v1 }
 0xa3b   : > { %v1668_v36 = vpop.f32.mrb[20].mxu0 }
 0xa3c   : > { %v2943_v37 = vpop.f32.mrb[21].mxu0  ;;  %v1669_v39 = vadd.f32 %v2471_v35, %v1668_v36 }
 0xa3d   : > { %v1671_v38 = vpop.f32.mrb[22].mxu0 }
 0xa3e   : > { %v1672_v40 = vadd.f32 %v2471_v35, %v1671_v38  ;;  %v2944_v41 = vpop.f32.mrb[23].mxu0 }
 0xa40   : > { %v1675_v42 = vpack.c.bf16 %v1672_v40, %v1669_v39 }
 0xa42   : > { %2962 = vmatmul.mubr.bf16.vlgmr.msra.gmra.mrb[20].mxu1 %v1675_v42 }
 0xa43   : > { %3001 = vmatprep.mubr.msk.bf16.mxu1 %vm3290_vm0, %v3289_v1  ;;  %2986 = vmatpush3.bf16.msra.mxu1 %v3189_v45 }
 0xa44   : > { %2987 = vmatprep.subr.bf16.mxu1 %v3289_v1 }
 0xa47   : > { %2988 = vmatpush3.bf16.msra.mxu1 %v3190_v46 }
 0xa48   : > { %2989 = vmatprep.subr.bf16.mxu1 %v3289_v1 }
 0xa4b   : > { %2990 = vmatpush3.bf16.msra.mxu1 %v3191_v47 }
 0xa4c   : > { %2991 = vmatprep.subr.bf16.mxu1 %v3289_v1 }
 0xa4f   : > { %2992 = vmatpush3.bf16.msra.mxu1 %v3192_v48 }
 0xa50   : > { %2993 = vmatprep.subr.bf16.mxu1 %v3289_v1 }
 0xa53   : > { %2994 = vmatpush3.bf16.msra.mxu1 %v3193_v49 }
 0xa54   : > { %2995 = vmatprep.subr.bf16.mxu1 %v3289_v1 }
 0xa57   : > { %2996 = vmatpush3.bf16.msra.mxu1 %v3194_v50 }
 0xa58   : > { %2997 = vmatprep.subr.bf16.mxu1 %v3289_v1 }
 0xa5b   : > { %2998 = vmatpush3.bf16.msra.mxu1 %v3195_v61 }
 0xa5c   : > { %2999 = vmatprep.subr.bf16.mxu1 %v3289_v1 }
 0xa5f   : > { %3000 = vmatpush3.bf16.msra.mxu1 %v3196_v62 }
 0xb15   : > { %v1783_v52 = vpop.f32.mrb[20].mxu1 }
 0xb16   : > { %v1784_v53 = vadd.f32 %v2497_v51, %v1783_v52  ;;  %v2963_v54 = vpop.f32.mrb[21].mxu1 }
 0xb17   : > { %v1786_v55 = vpop.f32.mrb[22].mxu1 }
 0xb18   : > { %v1787_v56 = vadd.f32 %v2497_v51, %v1786_v55  ;;  %v2964_v57 = vpop.f32.mrb[23].mxu1  ;;  %v1790_v58 = vmax.f32 %v1784_v53, 0.0 }
 0xb1a   : > { %v1791_v59 = vmax.f32 %v1787_v56, 0.0 }
 0xb1c   : > { %v1792_v60 = vpack.c.bf16 %v1791_v59, %v1790_v58 }
 0xb1e   : > { %2982 = vmatmul.mubr.bf16.vlgmr.msra.gmra.mrb[24].mxu0 %v1792_v60 }
 0xb1f   : > { %3021 = vmatprep.mubr.msk.bf16.mxu0 %vm3290_vm0, %v3289_v1  ;;  %3006 = vmatpush3.bf16.msra.mxu0 %v3197_v63 }
 0xb20   : > { %3007 = vmatprep.subr.bf16.mxu0 %v3289_v1 }
 0xb23   : > { %3008 = vmatpush3.bf16.msra.mxu0 %v3198_v0 }
 0xb24   : > { %3009 = vmatprep.subr.bf16.mxu0 %v3289_v1 }
 0xb27   : > { %3010 = vmatpush3.bf16.msra.mxu0 %v3199_v2 }
 0xb28   : > { %3011 = vmatprep.subr.bf16.mxu0 %v3289_v1 }
 0xb2b   : > { %3012 = vmatpush3.bf16.msra.mxu0 %v3200_v3 }
 0xb2c   : > { %3013 = vmatprep.subr.bf16.mxu0 %v3289_v1 }
 0xb2f   : > { %3014 = vmatpush3.bf16.msra.mxu0 %v3201_v4 }
 0xb30   : > { %3015 = vmatprep.subr.bf16.mxu0 %v3289_v1 }
 0xb33   : > { %3016 = vmatpush3.bf16.msra.mxu0 %v3202_v5 }
 0xb34   : > { %3017 = vmatprep.subr.bf16.mxu0 %v3289_v1 }
 0xb37   : > { %3018 = vmatpush3.bf16.msra.mxu0 %v3203_v14 }
 0xb38   : > { %3019 = vmatprep.subr.bf16.mxu0 %v3289_v1  ;;  %v2575_v1 = vld [vmem:[%s4039_s8 + $0x6] ss:$0 sm:$0xff] }
 0xb3b   : > { %3020 = vmatpush3.bf16.msra.mxu0 %v3204_v15 }
 0xbf1   : > { %v1900_v7 = vpop.f32.mrb[24].mxu0 }
 0xbf2   : > { %v2983_v8 = vpop.f32.mrb[25].mxu0  ;;  %v1901_v10 = vadd.f32 %v2523_v6, %v1900_v7 }
 0xbf3   : > { %v1903_v9 = vpop.f32.mrb[26].mxu0 }
 0xbf4   : > { %v1904_v11 = vadd.f32 %v2523_v6, %v1903_v9  ;;  %v2984_v12 = vpop.f32.mrb[27].mxu0 }
 0xbf6   : > { %v1907_v13 = vpack.c.bf16 %v1904_v11, %v1901_v10 }
 0xbf8   : > { %3002 = vmatmul.mubr.bf16.vlgmr.msra.gmra.mrb[24].mxu1 %v1907_v13 }
 0xccb   : > { %v2015_v17 = vpop.f32.mrb[24].mxu1 }
 0xccc   : > { %v2016_v18 = vadd.f32 %v2549_v16, %v2015_v17  ;;  %v3003_v19 = vpop.f32.mrb[25].mxu1 }
 0xccd   : > { %v2018_v20 = vpop.f32.mrb[26].mxu1 }
 0xcce   : > { %v2019_v21 = vadd.f32 %v2549_v16, %v2018_v20  ;;  %v3004_v22 = vpop.f32.mrb[27].mxu1  ;;  %v2022_v23 = vmax.f32 %v2016_v18, 0.0 }
 0xcd0   : > { %v2023_v24 = vmax.f32 %v2019_v21, 0.0 }
 0xcd2   : > { %v2024_v25 = vpack.c.bf16 %v2023_v24, %v2022_v23 }
 0xcd4   : > { %3022 = vmatmul.mubr.bf16.vlgmr.msra.gmra.mrb[28].mxu0 %v2024_v25 }
 0xda7   : > { %v2132_v26 = vpop.f32.mrb[28].mxu0 }
 0xda8   : > { %v2133_v27 = vadd.f32 %v2575_v1, %v2132_v26  ;;  %v3023_v28 = vpop.f32.mrb[29].mxu0 }
 0xda9   : > { %v2135_v29 = vpop.f32.mrb[30].mxu0 }
 0xdaa   : > { %2148 = vst [vmem:[%s338_s29] sm:$0xff] %v2133_v27  ;;  %v2136_v30 = vadd.f32 %v2575_v1, %v2135_v29  ;;  %v3024_v31 = vpop.f32.mrb[31].mxu0 }
 0xdac   : > { %2149 = vst [vmem:[%s338_s29 + $0x8] sm:$0xff] %v2136_v30 }
 0xdad   : > { %3222 = shalt.err (!%p3219_p5)
}
 0xdae   : > { %s3223_s25 = scalar_lea.hbm %s3983_s24, 256  ;;  %s3227_s18 = scalar_lea.hbm %s4040_s9, 512 }
 0xdaf   : > { %p3224_p6 = scmp.ne.s32.totalorder %s3983_s24, %s3223_s25  ;;  %p3228_p10 = scmp.lt.u32.totalorder %s3983_s24, %s4040_s9 }
 0xdb0   : > { %p3229_p11 = scmp.lt.u32.totalorder %s3227_s18, %s3223_s25  ;;  %p3231_p13 = scmp.lt.u32.totalorder %s3223_s25, %s3983_s24 }
 0xdb1   : > { %p3225_p7 = pnand %p3224_p6, %p3384_p4 }
 0xdb2   : > { %p3230_p12 = por %p3229_p11, %p3228_p10 }
 0xdb3   : > { %p3226_p9 = pneg %p3225_p7 }
 0xdb4   : > { %p3232_p0 = por %p3231_p13, %p3230_p12 }
 0xdb6   : > { %p3233_p1 = pnand %p3232_p0, %p3226_p9 }
 0xdb8   : > { %3236 = shalt.err (!%p3233_p1)
}
 0xdb9   : > { %s3292_s12 = smov 128   ;;  %s3293_s28 = smov 8  }
 0xdba   : > { %3025 = dma.vmem_to_hbm [thread:$0]  (%p3384_p4), %s3978_s15, 256, %s3983_s24, %s3985_s20, %s3292_s12, %s3292_s12, %s3293_s28  }
 0xdbb PF: > { %p3031_p2 = scmp.ge.s32.totalorder %s3287_s14, 2  ;;  %s2179_s27 = sand.u32 1, %s3267_s30  }
 0xdbc   : > { %s2180_s25 = scalar_lea.sflag [#allocation4], %s2179_s27 }
 0xdbd   : > { %p3028_p3 = pnand %p3031_p2, %p3391_p8 }
 0xdbf   : > { %3262 = dma.done.wait (!%p3028_p3), %s2180_s25, 256  }
 0xdc0   : > { %3264 = vsyncadd (!%p3028_p3), %s2180_s25, 4294967040  ;;  %s22_s14 = sadd.s32 1, %s3287_s14   ;;  %s4043_s30 = smov %s3271_s10 }
 0xdc1   : > { %p19_p5 = scmp.ge.s32.totalorder %s22_s14, 4   ;;  %s4044_s10 = smov %s3275_s11 }
 0xdc2   : > { %s4045_s11 = smov %s3397_s22  ;;  %s4046_s12 = smov %s3283_s13 }
 0xdc3   : > { %s4047_s13 = smov %s4049_s17  ;;  %21 = sbr.rel (!%p19_p5) target bundleno = 4 (0x4), region = 127 }
 0xdca   :  { %2185 = vsyncpa [#allocation4], 1 }
 0xdcb   :  { %2187 = vsyncpa [#allocation4 + $0x1], 1 }

</bundles_post_ra>
